<compile_context>
chip_gen: v7x
topology: tpu7x:2x2x1
jax: 0.10.0
libtpu: 0.0.40
codegen_flags: <defaults>
</compile_context>

<pallas_src>
import math
import jax
import jax.numpy as jnp
from jax import lax
from jax.experimental import pallas as pl
from jax.experimental.pallas import tpu as pltpu


def _round_up(x, m):
    return (x + m - 1) // m * m


# ---------------------------------------------------------------------------
# Pallas kernel: out = relu(x @ w + bias)   (bias broadcast on N)
# Full-K block per grid step -> no reduction axis, no scratch accumulator.
# bf16 operands, f32 accumulation inside the MXU dot.
# ---------------------------------------------------------------------------
def _matmul_bias_relu_kernel(x_ref, w_ref, b_ref, o_ref):
    acc = jnp.dot(x_ref[...], w_ref[...], preferred_element_type=jnp.float32)
    o_ref[...] = jnp.maximum(acc + b_ref[...], 0.0).astype(o_ref.dtype)


def fused_matmul_bias_relu(x, w, bias, *, out_dtype=jnp.float32,
                           tm_max=512, tn_max=256):
    """relu(x @ w + bias).  x:(M,K), w:(K,N), bias:(N,).  K kept whole."""
    M, K = x.shape
    K2, N = w.shape
    assert K == K2

    # Tile sizes: multiples of (16, 128) so bf16 blocks / lane-dense stores work
    # on all of v5e / v6e / v7x.  K is not tiled (<= ~1.7k for this net), so the
    # per-step VMEM footprint stays small (a few MiB, well under v7x's 64 MiB).
    tm = min(tm_max, _round_up(M, 16))
    tn = min(tn_max, _round_up(N, 128))
    Kp = _round_up(K, 128)
    Mp, Np = _round_up(M, tm), _round_up(N, tn)

    xp = jnp.pad(x.astype(jnp.bfloat16), ((0, Mp - M), (0, Kp - K)))
    wp = jnp.pad(w.astype(jnp.bfloat16), ((0, Kp - K), (0, Np - N)))
    bp = jnp.pad(bias.astype(jnp.float32).reshape(1, N), ((0, 0), (0, Np - N)))

    out = pl.pallas_call(
        _matmul_bias_relu_kernel,
        out_shape=jax.ShapeDtypeStruct((Mp, Np), out_dtype),
        grid=(Mp // tm, Np // tn),
        in_specs=[
            pl.BlockSpec((tm, Kp), lambda i, j: (i, 0)),
            pl.BlockSpec((Kp, tn), lambda i, j: (0, j)),
            pl.BlockSpec((1, tn), lambda i, j: (0, j)),
        ],
        out_specs=pl.BlockSpec((tm, tn), lambda i, j: (i, j)),
        compiler_params=pltpu.CompilerParams(
            dimension_semantics=("parallel", "parallel"),
            vmem_limit_bytes=32 * 1024 * 1024),
    )(xp, wp, bp)
    return out[:M, :N]


# ---------------------------------------------------------------------------
# Fused 2-layer head kernel: relu(relu(x@w1 + b1) @ w2 + b2) in one call.
# M (batch) is tiny and both weight matrices fit in VMEM.
# ---------------------------------------------------------------------------
def _head_kernel(x_ref, w1_ref, b1_ref, w2_ref, b2_ref, o_ref):
    h = jnp.dot(x_ref[...], w1_ref[...], preferred_element_type=jnp.float32)
    h = jnp.maximum(h + b1_ref[...], 0.0).astype(w2_ref.dtype)
    o = jnp.dot(h, w2_ref[...], preferred_element_type=jnp.float32)
    o_ref[...] = jnp.maximum(o + b2_ref[...], 0.0)


def fused_head(x, w1, b1, w2, b2):
    """x:(M,K1), w1:(K1,H), w2:(H,N). Returns relu(relu(x@w1+b1)@w2+b2)."""
    M, K1 = x.shape
    _, H = w1.shape
    _, N = w2.shape
    Mp = _round_up(M, 16)
    K1p = _round_up(K1, 128)
    Hp = _round_up(H, 128)
    Np = _round_up(N, 128)

    xp = jnp.pad(x.astype(jnp.bfloat16), ((0, Mp - M), (0, K1p - K1)))
    w1p = jnp.pad(w1.astype(jnp.bfloat16), ((0, K1p - K1), (0, Hp - H)))
    b1p = jnp.pad(b1.astype(jnp.float32).reshape(1, H), ((0, 0), (0, Hp - H)))
    w2p = jnp.pad(w2.astype(jnp.bfloat16), ((0, Hp - H), (0, Np - N)))
    b2p = jnp.pad(b2.astype(jnp.float32).reshape(1, N), ((0, 0), (0, Np - N)))

    out = pl.pallas_call(
        _head_kernel,
        out_shape=jax.ShapeDtypeStruct((Mp, Np), jnp.float32),
        grid=(1,),
        in_specs=[
            pl.BlockSpec((Mp, K1p), lambda i: (0, 0)),
            pl.BlockSpec((K1p, Hp), lambda i: (0, 0)),
            pl.BlockSpec((1, Hp), lambda i: (0, 0)),
            pl.BlockSpec((Hp, Np), lambda i: (0, 0)),
            pl.BlockSpec((1, Np), lambda i: (0, 0)),
        ],
        out_specs=pl.BlockSpec((Mp, Np), lambda i: (0, 0)),
        compiler_params=pltpu.CompilerParams(
            dimension_semantics=("arbitrary",),
            vmem_limit_bytes=32 * 1024 * 1024),
    )(xp, w1p, b1p, w2p, b2p)
    return out[:M, :N]


# ---------------------------------------------------------------------------
# Glue: im2col for Conv2d(kernel=5, stride=2, padding=2)  (NHWC, bf16)
# ---------------------------------------------------------------------------
def _im2col(x_nhwc, k=5, stride=2, pad=2):
    B, Hh, Ww, C = x_nhwc.shape
    Ho = (Hh + 2 * pad - k) // stride + 1
    Wo = (Ww + 2 * pad - k) // stride + 1
    xp = jnp.pad(x_nhwc, ((0, 0), (pad, pad), (pad, pad), (0, 0)))
    cols = []
    for i in range(k):
        for j in range(k):
            cols.append(xp[:, i:i + stride * Ho:stride, j:j + stride * Wo:stride, :])
    patches = jnp.stack(cols, axis=3)                    # (B, Ho, Wo, k*k, C)
    return patches.reshape(B * Ho * Wo, k * k * C), Ho, Wo


# ---------------------------------------------------------------------------
# One-time parameter preparation: fold BN into conv weights (bf16), permute /
# pre-transpose head weights so the forward pass is pure kernel calls.
# ---------------------------------------------------------------------------
def prepare_params(params, state_shape):
    eps = 1e-5
    body = []
    for p in params["body"]:
        cout = p["w"].shape[0]
        inv_std = 1.0 / jnp.sqrt(p["rvar"] + eps)
        scale = p["gamma"] * inv_std
        bias = (p["b"] - p["rmean"]) * scale + p["beta"]
        # (Cout,Cin,kH,kW) -> (kH,kW,Cin,Cout) -> (kH*kW*Cin, Cout), scale folded.
        wmat = jnp.transpose(p["w"], (2, 3, 1, 0)).reshape(-1, cout) * scale[None, :]
        body.append(dict(w=wmat.astype(jnp.bfloat16), b=bias.astype(jnp.float32)))

    # Head layer 1: permute input features from NCHW-flat to NHWC-flat order
    # and pre-transpose to (in, out), so the forward needs no activation
    # transpose and no runtime weight transpose.
    _, h, w = state_shape
    n_blocks = len(params["body"])
    ho = math.ceil(h / 2 ** n_blocks)
    wo = math.ceil(w / 2 ** n_blocks)
    c_last = params["body"][-1]["w"].shape[0]

    w1 = params["head"][0]["w"]                          # (hidden, c*ho*wo) NCHW-flat cols
    hidden = w1.shape[0]
    w1 = w1.reshape(hidden, c_last, ho, wo).transpose(0, 2, 3, 1)
    w1 = w1.reshape(hidden, ho * wo * c_last)
    w2 = params["head"][1]["w"]                          # (num_actions, hidden)

    head = [
        dict(w=w1.T.astype(jnp.bfloat16), b=params["head"][0]["b"].astype(jnp.float32)),
        dict(w=w2.T.astype(jnp.bfloat16), b=params["head"][1]["b"].astype(jnp.float32)),
    ]
    return dict(body=body, head=head)


# ---------------------------------------------------------------------------
# DQN forward (uses prepared params)
# ---------------------------------------------------------------------------
def dqn_forward(x_nchw, prep):
    x = jnp.transpose(x_nchw, (0, 2, 3, 1)).astype(jnp.bfloat16)   # NHWC
    for p in prep["body"]:
        B = x.shape[0]
        cout = p["w"].shape[1]
        patches, Ho, Wo = _im2col(x)
        y = fused_matmul_bias_relu(patches, p["w"], p["b"], out_dtype=jnp.bfloat16)
        x = y.reshape(B, Ho, Wo, cout)
    x = x.reshape(x.shape[0], -1)            # NHWC flatten (head weight pre-permuted)
    h1, h2 = prep["head"]
    return fused_head(x, h1["w"], h1["b"], h2["w"], h2["b"])


# ---------------------------------------------------------------------------
# Deterministic parameter construction (PyTorch layout)
# ---------------------------------------------------------------------------
def init_params(state_shape, head_fets=(512,), num_actions=4, seed=0):
    in_channels, h, w = state_shape
    chans = [(in_channels, 32), (32, 48), (48, 48), (48, 64), (64, 64)]
    h_out = math.ceil(h / 2 ** len(chans))
    w_out = math.ceil(w / 2 ** len(chans))

    key = jax.random.PRNGKey(seed)
    body = []
    for cin, cout in chans:
        key, k1, k2, k3, k4, k5, k6 = jax.random.split(key, 7)
        fan_in = cin * 5 * 5
        body.append(dict(
            w=jax.random.normal(k1, (cout, cin, 5, 5), jnp.float32) / math.sqrt(fan_in),
            b=0.01 * jax.random.normal(k2, (cout,), jnp.float32),
            gamma=1.0 + 0.1 * jax.random.normal(k3, (cout,), jnp.float32),
            beta=0.1 * jax.random.normal(k4, (cout,), jnp.float32),
            rmean=0.1 * jax.random.normal(k5, (cout,), jnp.float32),
            rvar=0.5 + jnp.abs(jax.random.normal(k6, (cout,), jnp.float32)),
        ))

    dims = [(64 * h_out * w_out, head_fets[0]), (head_fets[-1], num_actions)]
    head = []
    for din, dout in dims:
        key, k1, k2 = jax.random.split(key, 3)
        head.append(dict(
            w=jax.random.normal(k1, (dout, din), jnp.float32) / math.sqrt(din),
            b=0.01 * jax.random.normal(k2, (dout,), jnp.float32),
        ))
    return dict(body=body, head=head)


# ---------------------------------------------------------------------------
# Pure-JAX reference (mirrors the kernel's bf16-input / f32-accumulate math)
# ---------------------------------------------------------------------------
def dqn_reference(x_nchw, params):
    eps = 1e-5
    x = jnp.transpose(x_nchw, (0, 2, 3, 1)).astype(jnp.float32)
    for p in params["body"]:
        inv_std = 1.0 / jnp.sqrt(p["rvar"] + eps)
        scale = p["gamma"] * inv_std
        bias = (p["b"] - p["rmean"]) * scale + p["beta"]
        w_hwio = jnp.transpose(p["w"], (2, 3, 1, 0)) * scale       # fold BN scale
        y = lax.conv_general_dilated(
            x.astype(jnp.bfloat16), w_hwio.astype(jnp.bfloat16),
            window_strides=(2, 2), padding=[(2, 2), (2, 2)],
            dimension_numbers=("NHWC", "HWIO", "NHWC"),
            preferred_element_type=jnp.float32)
        x = jnp.maximum(y + bias, 0.0)
    # PyTorch-style flatten on NCHW layout with the original (unpermuted) weights.
    x = jnp.transpose(x, (0, 3, 1, 2)).reshape(x.shape[0], -1)
    for p in params["head"]:
        y = jnp.dot(x.astype(jnp.bfloat16), p["w"].T.astype(jnp.bfloat16),
                    preferred_element_type=jnp.float32)
        x = jnp.maximum(y + p["b"], 0.0)
    return x


if __name__ == "__main__":
    state_shape = (4, 16, 16)      # (C, H, W) — small, consistent with the module
    batch = 2
    params = init_params(state_shape, head_fets=(512,), num_actions=4, seed=0)
    prep = prepare_params(params, state_shape)

    key = jax.random.PRNGKey(0)
    x = jax.random.normal(key, (batch,) + state_shape, jnp.float32)   # NCHW input

    fwd = jax.jit(dqn_forward)
    out = jax.block_until_ready(fwd(x, prep))
    ref = jax.block_until_ready(dqn_reference(x, params))

    assert out.shape == (batch, 4), out.shape
    # bf16 MXU operands -> compare against a matching bf16/f32-accum reference.
    assert jnp.allclose(out, ref, atol=2e-2, rtol=2e-2), float(jnp.max(jnp.abs(out - ref)))
    print("KERNEL_OK")
</pallas_src>

<mosaic_0001>
module attributes {stable_mosaic.version = 11 : i64} {
  func.func @_matmul_bias_relu_kernel(%arg0: i32, %arg1: i32, %arg2: memref<128x128xbf16, #tpu.memory_space<vmem>>, %arg3: memref<128x128xbf16, #tpu.memory_space<vmem>>, %arg4: memref<1x128xf32, #tpu.memory_space<vmem>>, %arg5: memref<128x128xbf16, #tpu.memory_space<vmem>>) attributes {dimension_semantics = [#tpu.dimension_semantics<parallel>, #tpu.dimension_semantics<parallel>], iteration_bounds = array<i64: 1, 1>, scalar_prefetch = 0 : i64, scratch_operands = 0 : i64, tpu.core_type = #tpu.core_type<tc>, window_params = [{transform_indices = @transform_0, window_bounds = array<i64: 128, 128>}, {transform_indices = @transform_1, window_bounds = array<i64: 128, 128>}, {transform_indices = @transform_2, window_bounds = array<i64: 1, 128>}, {transform_indices = @transform_3, window_bounds = array<i64: 128, 128>}]} {
    %c0 = arith.constant 0 : index
    %c0_0 = arith.constant 0 : index
    %0 = vector.load %arg2[%c0, %c0_0] : memref<128x128xbf16, #tpu.memory_space<vmem>>, vector<128x128xbf16>
    %c0_1 = arith.constant 0 : index
    %c0_2 = arith.constant 0 : index
    %1 = vector.load %arg3[%c0_1, %c0_2] : memref<128x128xbf16, #tpu.memory_space<vmem>>, vector<128x128xbf16>
    %cst = arith.constant dense<0.000000e+00> : vector<128x128xf32>
    %2 = tpu.matmul %0, %1, %cst {dimension_numbers = #tpu.dot_dimension_numbers<[1], [0], [0], [1], [0, 0, 1, 1], [], []>} : vector<128x128xbf16>, vector<128x128xbf16>, vector<128x128xf32> -> vector<128x128xf32>
    %c0_3 = arith.constant 0 : index
    %c0_4 = arith.constant 0 : index
    %3 = vector.load %arg4[%c0_3, %c0_4] : memref<1x128xf32, #tpu.memory_space<vmem>>, vector<1x128xf32>
    %4 = vector.broadcast %3 : vector<1x128xf32> to vector<128x128xf32>
    %5 = arith.addf %2, %4 : vector<128x128xf32>
    %cst_5 = arith.constant 0.000000e+00 : f32
    %6 = vector.broadcast %cst_5 : f32 to vector<128x128xf32>
    %7 = arith.maximumf %5, %6 : vector<128x128xf32>
    %8 = arith.truncf %7 : vector<128x128xf32> to vector<128x128xbf16>
    %c0_6 = arith.constant 0 : index
    %c0_7 = arith.constant 0 : index
    %9 = vector.load %arg5[%c0_6, %c0_7] : memref<128x128xbf16, #tpu.memory_space<vmem>>, vector<128x128xbf16>
    tpu.vector_store %arg5[%c0_6, %c0_7], %8 {strides = array<i32>} : memref<128x128xbf16, #tpu.memory_space<vmem>>, vector<128x128xbf16>,
    return
  }
  func.func @transform_0(%arg0: i32, %arg1: i32) -> (i32, i32) {
    %c0_i32 = arith.constant 0 : i32
    %c0_i32_0 = arith.constant 0 : i32
    return %arg0, %c0_i32 : i32, i32
  }
  func.func @transform_1(%arg0: i32, %arg1: i32) -> (i32, i32) {
    %c0_i32 = arith.constant 0 : i32
    %c0_i32_0 = arith.constant 0 : i32
    return %c0_i32, %arg1 : i32, i32
  }
  func.func @transform_2(%arg0: i32, %arg1: i32) -> (i32, i32) {
    %c0_i32 = arith.constant 0 : i32
    %c0_i32_0 = arith.constant 0 : i32
    return %c0_i32, %arg1 : i32, i32
  }
  func.func @transform_3(%arg0: i32, %arg1: i32) -> (i32, i32) {
    %c0_i32 = arith.constant 0 : i32
    return %arg0, %arg1 : i32, i32
  }
}

module attributes {stable_mosaic.version = 11 : i64} {
  func.func @_matmul_bias_relu_kernel(%arg0: i32, %arg1: i32, %arg2: memref<32x896xbf16, #tpu.memory_space<vmem>>, %arg3: memref<896x128xbf16, #tpu.memory_space<vmem>>, %arg4: memref<1x128xf32, #tpu.memory_space<vmem>>, %arg5: memref<32x128xbf16, #tpu.memory_space<vmem>>) attributes {dimension_semantics = [#tpu.dimension_semantics<parallel>, #tpu.dimension_semantics<parallel>], iteration_bounds = array<i64: 1, 1>, scalar_prefetch = 0 : i64, scratch_operands = 0 : i64, tpu.core_type = #tpu.core_type<tc>, window_params = [{transform_indices = @transform_0, window_bounds = array<i64: 32, 896>}, {transform_indices = @transform_1, window_bounds = array<i64: 896, 128>}, {transform_indices = @transform_2, window_bounds = array<i64: 1, 128>}, {transform_indices = @transform_3, window_bounds = array<i64: 32, 128>}]} {
    %c0 = arith.constant 0 : index
    %c0_0 = arith.constant 0 : index
    %0 = vector.load %arg2[%c0, %c0_0] : memref<32x896xbf16, #tpu.memory_space<vmem>>, vector<32x896xbf16>
    %c0_1 = arith.constant 0 : index
    %c0_2 = arith.constant 0 : index
    %1 = vector.load %arg3[%c0_1, %c0_2] : memref<896x128xbf16, #tpu.memory_space<vmem>>, vector<896x128xbf16>
    %cst = arith.constant dense<0.000000e+00> : vector<32x128xf32>
    %2 = tpu.matmul %0, %1, %cst {dimension_numbers = #tpu.dot_dimension_numbers<[1], [0], [0], [1], [0, 0, 1, 1], [], []>} : vector<32x896xbf16>, vector<896x128xbf16>, vector<32x128xf32> -> vector<32x128xf32>
    %c0_3 = arith.constant 0 : index
    %c0_4 = arith.constant 0 : index
    %3 = vector.load %arg4[%c0_3, %c0_4] : memref<1x128xf32, #tpu.memory_space<vmem>>, vector<1x128xf32>
    %4 = vector.broadcast %3 : vector<1x128xf32> to vector<32x128xf32>
    %5 = arith.addf %2, %4 : vector<32x128xf32>
    %cst_5 = arith.constant 0.000000e+00 : f32
    %6 = vector.broadcast %cst_5 : f32 to vector<32x128xf32>
    %7 = arith.maximumf %5, %6 : vector<32x128xf32>
    %8 = arith.truncf %7 : vector<32x128xf32> to vector<32x128xbf16>
    %c0_6 = arith.constant 0 : index
    %c0_7 = arith.constant 0 : index
    %9 = vector.load %arg5[%c0_6, %c0_7] : memref<32x128xbf16, #tpu.memory_space<vmem>>, vector<32x128xbf16>
    tpu.vector_store %arg5[%c0_6, %c0_7], %8 {strides = array<i32>} : memref<32x128xbf16, #tpu.memory_space<vmem>>, vector<32x128xbf16>,
    return
  }
  func.func @transform_0(%arg0: i32, %arg1: i32) -> (i32, i32) {
    %c0_i32 = arith.constant 0 : i32
    %c0_i32_0 = arith.constant 0 : i32
    return %arg0, %c0_i32 : i32, i32
  }
  func.func @transform_1(%arg0: i32, %arg1: i32) -> (i32, i32) {
    %c0_i32 = arith.constant 0 : i32
    %c0_i32_0 = arith.constant 0 : i32
    return %c0_i32, %arg1 : i32, i32
  }
  func.func @transform_2(%arg0: i32, %arg1: i32) -> (i32, i32) {
    %c0_i32 = arith.constant 0 : i32
    %c0_i32_0 = arith.constant 0 : i32
    return %c0_i32, %arg1 : i32, i32
  }
  func.func @transform_3(%arg0: i32, %arg1: i32) -> (i32, i32) {
    %c0_i32 = arith.constant 0 : i32
    return %arg0, %arg1 : i32, i32
  }
}

module attributes {stable_mosaic.version = 11 : i64} {
  func.func @_matmul_bias_relu_kernel(%arg0: i32, %arg1: i32, %arg2: memref<16x1280xbf16, #tpu.memory_space<vmem>>, %arg3: memref<1280x128xbf16, #tpu.memory_space<vmem>>, %arg4: memref<1x128xf32, #tpu.memory_space<vmem>>, %arg5: memref<16x128xbf16, #tpu.memory_space<vmem>>) attributes {dimension_semantics = [#tpu.dimension_semantics<parallel>, #tpu.dimension_semantics<parallel>], iteration_bounds = array<i64: 1, 1>, scalar_prefetch = 0 : i64, scratch_operands = 0 : i64, tpu.core_type = #tpu.core_type<tc>, window_params = [{transform_indices = @transform_0, window_bounds = array<i64: 16, 1280>}, {transform_indices = @transform_1, window_bounds = array<i64: 1280, 128>}, {transform_indices = @transform_2, window_bounds = array<i64: 1, 128>}, {transform_indices = @transform_3, window_bounds = array<i64: 16, 128>}]} {
    %c0 = arith.constant 0 : index
    %c0_0 = arith.constant 0 : index
    %0 = vector.load %arg2[%c0, %c0_0] : memref<16x1280xbf16, #tpu.memory_space<vmem>>, vector<16x1280xbf16>
    %c0_1 = arith.constant 0 : index
    %c0_2 = arith.constant 0 : index
    %1 = vector.load %arg3[%c0_1, %c0_2] : memref<1280x128xbf16, #tpu.memory_space<vmem>>, vector<1280x128xbf16>
    %cst = arith.constant dense<0.000000e+00> : vector<16x128xf32>
    %2 = tpu.matmul %0, %1, %cst {dimension_numbers = #tpu.dot_dimension_numbers<[1], [0], [0], [1], [0, 0, 1, 1], [], []>} : vector<16x1280xbf16>, vector<1280x128xbf16>, vector<16x128xf32> -> vector<16x128xf32>
    %c0_3 = arith.constant 0 : index
    %c0_4 = arith.constant 0 : index
    %3 = vector.load %arg4[%c0_3, %c0_4] : memref<1x128xf32, #tpu.memory_space<vmem>>, vector<1x128xf32>
    %4 = vector.broadcast %3 : vector<1x128xf32> to vector<16x128xf32>
    %5 = arith.addf %2, %4 : vector<16x128xf32>
    %cst_5 = arith.constant 0.000000e+00 : f32
    %6 = vector.broadcast %cst_5 : f32 to vector<16x128xf32>
    %7 = arith.maximumf %5, %6 : vector<16x128xf32>
    %8 = arith.truncf %7 : vector<16x128xf32> to vector<16x128xbf16>
    %c0_6 = arith.constant 0 : index
    %c0_7 = arith.constant 0 : index
    %9 = vector.load %arg5[%c0_6, %c0_7] : memref<16x128xbf16, #tpu.memory_space<vmem>>, vector<16x128xbf16>
    tpu.vector_store %arg5[%c0_6, %c0_7], %8 {strides = array<i32>} : memref<16x128xbf16, #tpu.memory_space<vmem>>, vector<16x128xbf16>,
    return
  }
  func.func @transform_0(%arg0: i32, %arg1: i32) -> (i32, i32) {
    %c0_i32 = arith.constant 0 : i32
    %c0_i32_0 = arith.constant 0 : i32
    return %arg0, %c0_i32 : i32, i32
  }
  func.func @transform_1(%arg0: i32, %arg1: i32) -> (i32, i32) {
    %c0_i32 = arith.constant 0 : i32
    %c0_i32_0 = arith.constant 0 : i32
    return %c0_i32, %arg1 : i32, i32
  }
  func.func @transform_2(%arg0: i32, %arg1: i32) -> (i32, i32) {
    %c0_i32 = arith.constant 0 : i32
    %c0_i32_0 = arith.constant 0 : i32
    return %c0_i32, %arg1 : i32, i32
  }
  func.func @transform_3(%arg0: i32, %arg1: i32) -> (i32, i32) {
    %c0_i32 = arith.constant 0 : i32
    return %arg0, %arg1 : i32, i32
  }
}

module attributes {stable_mosaic.version = 11 : i64} {
  func.func @_matmul_bias_relu_kernel(%arg0: i32, %arg1: i32, %arg2: memref<16x1664xbf16, #tpu.memory_space<vmem>>, %arg3: memref<1664x128xbf16, #tpu.memory_space<vmem>>, %arg4: memref<1x128xf32, #tpu.memory_space<vmem>>, %arg5: memref<16x128xbf16, #tpu.memory_space<vmem>>) attributes {dimension_semantics = [#tpu.dimension_semantics<parallel>, #tpu.dimension_semantics<parallel>], iteration_bounds = array<i64: 1, 1>, scalar_prefetch = 0 : i64, scratch_operands = 0 : i64, tpu.core_type = #tpu.core_type<tc>, window_params = [{transform_indices = @transform_0, window_bounds = array<i64: 16, 1664>}, {transform_indices = @transform_1, window_bounds = array<i64: 1664, 128>}, {transform_indices = @transform_2, window_bounds = array<i64: 1, 128>}, {transform_indices = @transform_3, window_bounds = array<i64: 16, 128>}]} {
    %c0 = arith.constant 0 : index
    %c0_0 = arith.constant 0 : index
    %0 = vector.load %arg2[%c0, %c0_0] : memref<16x1664xbf16, #tpu.memory_space<vmem>>, vector<16x1664xbf16>
    %c0_1 = arith.constant 0 : index
    %c0_2 = arith.constant 0 : index
    %1 = vector.load %arg3[%c0_1, %c0_2] : memref<1664x128xbf16, #tpu.memory_space<vmem>>, vector<1664x128xbf16>
    %cst = arith.constant dense<0.000000e+00> : vector<16x128xf32>
    %2 = tpu.matmul %0, %1, %cst {dimension_numbers = #tpu.dot_dimension_numbers<[1], [0], [0], [1], [0, 0, 1, 1], [], []>} : vector<16x1664xbf16>, vector<1664x128xbf16>, vector<16x128xf32> -> vector<16x128xf32>
    %c0_3 = arith.constant 0 : index
    %c0_4 = arith.constant 0 : index
    %3 = vector.load %arg4[%c0_3, %c0_4] : memref<1x128xf32, #tpu.memory_space<vmem>>, vector<1x128xf32>
    %4 = vector.broadcast %3 : vector<1x128xf32> to vector<16x128xf32>
    %5 = arith.addf %2, %4 : vector<16x128xf32>
    %cst_5 = arith.constant 0.000000e+00 : f32
    %6 = vector.broadcast %cst_5 : f32 to vector<16x128xf32>
    %7 = arith.maximumf %5, %6 : vector<16x128xf32>
    %8 = arith.truncf %7 : vector<16x128xf32> to vector<16x128xbf16>
    %c0_6 = arith.constant 0 : index
    %c0_7 = arith.constant 0 : index
    %9 = vector.load %arg5[%c0_6, %c0_7] : memref<16x128xbf16, #tpu.memory_space<vmem>>, vector<16x128xbf16>
    tpu.vector_store %arg5[%c0_6, %c0_7], %8 {strides = array<i32>} : memref<16x128xbf16, #tpu.memory_space<vmem>>, vector<16x128xbf16>,
    return
  }
  func.func @transform_0(%arg0: i32, %arg1: i32) -> (i32, i32) {
    %c0_i32 = arith.constant 0 : i32
    %c0_i32_0 = arith.constant 0 : i32
    return %arg0, %c0_i32 : i32, i32
  }
  func.func @transform_1(%arg0: i32, %arg1: i32) -> (i32, i32) {
    %c0_i32 = arith.constant 0 : i32
    %c0_i32_0 = arith.constant 0 : i32
    return %c0_i32, %arg1 : i32, i32
  }
  func.func @transform_2(%arg0: i32, %arg1: i32) -> (i32, i32) {
    %c0_i32 = arith.constant 0 : i32
    %c0_i32_0 = arith.constant 0 : i32
    return %c0_i32, %arg1 : i32, i32
  }
  func.func @transform_3(%arg0: i32, %arg1: i32) -> (i32, i32) {
    %c0_i32 = arith.constant 0 : i32
    return %arg0, %arg1 : i32, i32
  }
}

module attributes {stable_mosaic.version = 11 : i64} {
  func.func @_head_kernel(%arg0: i32, %arg1: memref<16x128xbf16, #tpu.memory_space<vmem>>, %arg2: memref<128x512xbf16, #tpu.memory_space<vmem>>, %arg3: memref<1x512xf32, #tpu.memory_space<vmem>>, %arg4: memref<512x128xbf16, #tpu.memory_space<vmem>>, %arg5: memref<1x128xf32, #tpu.memory_space<vmem>>, %arg6: memref<16x128xf32, #tpu.memory_space<vmem>>) attributes {dimension_semantics = [#tpu.dimension_semantics<arbitrary>], iteration_bounds = array<i64: 1>, scalar_prefetch = 0 : i64, scratch_operands = 0 : i64, tpu.core_type = #tpu.core_type<tc>, window_params = [{pipeline_mode = #tpu.pipeline_mode<synchronous>, transform_indices = @transform_0, window_bounds = array<i64: 16, 128>}, {pipeline_mode = #tpu.pipeline_mode<synchronous>, transform_indices = @transform_1, window_bounds = array<i64: 128, 512>}, {pipeline_mode = #tpu.pipeline_mode<synchronous>, transform_indices = @transform_2, window_bounds = array<i64: 1, 512>}, {pipeline_mode = #tpu.pipeline_mode<synchronous>, transform_indices = @transform_3, window_bounds = array<i64: 512, 128>}, {pipeline_mode = #tpu.pipeline_mode<synchronous>, transform_indices = @transform_4, window_bounds = array<i64: 1, 128>}, {pipeline_mode = #tpu.pipeline_mode<synchronous>, transform_indices = @transform_5, window_bounds = array<i64: 16, 128>}]} {
    %c0 = arith.constant 0 : index
    %c0_0 = arith.constant 0 : index
    %0 = vector.load %arg1[%c0, %c0_0] : memref<16x128xbf16, #tpu.memory_space<vmem>>, vector<16x128xbf16>
    %c0_1 = arith.constant 0 : index
    %c0_2 = arith.constant 0 : index
    %1 = vector.load %arg2[%c0_1, %c0_2] : memref<128x512xbf16, #tpu.memory_space<vmem>>, vector<128x512xbf16>
    %cst = arith.constant dense<0.000000e+00> : vector<16x512xf32>
    %2 = tpu.matmul %0, %1, %cst {dimension_numbers = #tpu.dot_dimension_numbers<[1], [0], [0], [1], [0, 0, 1, 1], [], []>} : vector<16x128xbf16>, vector<128x512xbf16>, vector<16x512xf32> -> vector<16x512xf32>
    %c0_3 = arith.constant 0 : index
    %c0_4 = arith.constant 0 : index
    %3 = vector.load %arg3[%c0_3, %c0_4] : memref<1x512xf32, #tpu.memory_space<vmem>>, vector<1x512xf32>
    %4 = vector.broadcast %3 : vector<1x512xf32> to vector<16x512xf32>
    %5 = arith.addf %2, %4 : vector<16x512xf32>
    %cst_5 = arith.constant 0.000000e+00 : f32
    %6 = vector.broadcast %cst_5 : f32 to vector<16x512xf32>
    %7 = arith.maximumf %5, %6 : vector<16x512xf32>
    %8 = arith.truncf %7 : vector<16x512xf32> to vector<16x512xbf16>
    %c0_6 = arith.constant 0 : index
    %c0_7 = arith.constant 0 : index
    %9 = vector.load %arg4[%c0_6, %c0_7] : memref<512x128xbf16, #tpu.memory_space<vmem>>, vector<512x128xbf16>
    %cst_8 = arith.constant dense<0.000000e+00> : vector<16x128xf32>
    %10 = tpu.matmul %8, %9, %cst_8 {dimension_numbers = #tpu.dot_dimension_numbers<[1], [0], [0], [1], [0, 0, 1, 1], [], []>} : vector<16x512xbf16>, vector<512x128xbf16>, vector<16x128xf32> -> vector<16x128xf32>
    %c0_9 = arith.constant 0 : index
    %c0_10 = arith.constant 0 : index
    %11 = vector.load %arg5[%c0_9, %c0_10] : memref<1x128xf32, #tpu.memory_space<vmem>>, vector<1x128xf32>
    %12 = vector.broadcast %11 : vector<1x128xf32> to vector<16x128xf32>
    %13 = arith.addf %10, %12 : vector<16x128xf32>
    %cst_11 = arith.constant 0.000000e+00 : f32
    %14 = vector.broadcast %cst_11 : f32 to vector<16x128xf32>
    %15 = arith.maximumf %13, %14 : vector<16x128xf32>
    %c0_12 = arith.constant 0 : index
    %c0_13 = arith.constant 0 : index
    %16 = vector.load %arg6[%c0_12, %c0_13] : memref<16x128xf32, #tpu.memory_space<vmem>>, vector<16x128xf32>
    tpu.vector_store %arg6[%c0_12, %c0_13], %15 {strides = array<i32>} : memref<16x128xf32, #tpu.memory_space<vmem>>, vector<16x128xf32>,
    return
  }
  func.func @transform_0(%arg0: i32) -> (i32, i32) {
    %c0_i32 = arith.constant 0 : i32
    %c0_i32_0 = arith.constant 0 : i32
    %c0_i32_1 = arith.constant 0 : i32
    return %c0_i32, %c0_i32_0 : i32, i32
  }
  func.func @transform_1(%arg0: i32) -> (i32, i32) {
    %c0_i32 = arith.constant 0 : i32
    %c0_i32_0 = arith.constant 0 : i32
    %c0_i32_1 = arith.constant 0 : i32
    return %c0_i32, %c0_i32_0 : i32, i32
  }
  func.func @transform_2(%arg0: i32) -> (i32, i32) {
    %c0_i32 = arith.constant 0 : i32
    %c0_i32_0 = arith.constant 0 : i32
    %c0_i32_1 = arith.constant 0 : i32
    return %c0_i32, %c0_i32_0 : i32, i32
  }
  func.func @transform_3(%arg0: i32) -> (i32, i32) {
    %c0_i32 = arith.constant 0 : i32
    %c0_i32_0 = arith.constant 0 : i32
    %c0_i32_1 = arith.constant 0 : i32
    return %c0_i32, %c0_i32_0 : i32, i32
  }
  func.func @transform_4(%arg0: i32) -> (i32, i32) {
    %c0_i32 = arith.constant 0 : i32
    %c0_i32_0 = arith.constant 0 : i32
    %c0_i32_1 = arith.constant 0 : i32
    return %c0_i32, %c0_i32_0 : i32, i32
  }
  func.func @transform_5(%arg0: i32) -> (i32, i32) {
    %c0_i32 = arith.constant 0 : i32
    %c0_i32_0 = arith.constant 0 : i32
    %c0_i32_1 = arith.constant 0 : i32
    return %c0_i32, %c0_i32_0 : i32, i32
  }
}

</mosaic_0001>

<bundles_post_ra>
// kernel: dqn_forward.6
= control target key start
LH: loop header
LB: loop body
LE: loop exit
PB: predicated region body
PF: predicated region fallthrough
CT: control target
= control target key end

     0   :  { %s618_s1 = inlined_call_operand.vmem [shape: bf16[128,128], index: 1, kind: input, shape index: {}]   ;;  %s619_s0 = inlined_call_operand.vmem [shape: bf16[128,128], index: 0, kind: input, shape index: {}]   ;;  %s620_s2 = inlined_call_operand.vmem [shape: f32[1,128], index: 2, kind: input, shape index: {}]   ;;  %s621_s3 = inlined_call_operand.vmem [shape: bf16[128,128], index: 3, kind: output, shape index: {}]  }
   0x1   :  { %v507_v0 = vld [vmem:[%s618_s1] sm:$0xff]   ;;  %v508_v1 = vld [vmem:[%s618_s1 + $0x8] sm:$0xff]   ;;  %v509_v2 = vld [vmem:[%s618_s1 + $0x10] sm:$0xff]  }
   0x2   :  { %459 = vmatprep.subr.bf16.mxu0 %v507_v0  ;;  %491 = vmatprep.subr.bf16.mxu1 %v507_v0  ;;  %v510_v3 = vld [vmem:[%s618_s1 + $0x18] sm:$0xff]   ;;  %v515_v4 = vld [vmem:[%s619_s0] sm:$0xff]   ;;  %v512_v7 = vld [vmem:[%s618_s1 + $0x28] sm:$0xff]  }
   0x3   :  { %460 = vmatpush3.bf16.msra.mxu0 %v507_v0  ;;  %499 = vmatpush3.bf16.msra.mxu1 %v507_v0  ;;  %v516_v5 = vld [vmem:[%s619_s0 + $0x20] sm:$0xff]   ;;  %v513_v8 = vld [vmem:[%s618_s1 + $0x30] sm:$0xff]   ;;  %v514_v9 = vld [vmem:[%s618_s1 + $0x38] sm:$0xff]  }
   0x4   :  { %461 = vmatprep.subr.bf16.mxu0 %v508_v1  ;;  %492 = vmatprep.subr.bf16.mxu1 %v508_v1  ;;  %v511_v6 = vld [vmem:[%s618_s1 + $0x20] sm:$0xff]   ;;  %v517_v10 = vld [vmem:[%s619_s0 + $0x8] sm:$0xff]   ;;  %v519_v12 = vld [vmem:[%s619_s0 + $0x10] sm:$0xff]  }
   0x5   :  { %475 = vmatprep.mubr.bf16.mxu0 %v515_v4  ;;  %483 = vmatprep.mubr.bf16.mxu1 %v516_v5  ;;  %v518_v11 = vld [vmem:[%s619_s0 + $0x28] sm:$0xff]   ;;  %v520_v13 = vld [vmem:[%s619_s0 + $0x30] sm:$0xff]   ;;  %v521_v14 = vld [vmem:[%s619_s0 + $0x18] sm:$0xff]  }
   0x6   :  { %v522_v15 = vld [vmem:[%s619_s0 + $0x38] sm:$0xff]   ;;  %v347_v16 = vld [vmem:[%s620_s2] ss:$0 sm:$0xff] }
   0x7   :  { %462 = vmatpush3.bf16.msra.mxu0 %v508_v1  ;;  %500 = vmatpush3.bf16.msra.mxu1 %v508_v1 }
   0x8   :  { %463 = vmatprep.subr.bf16.mxu0 %v509_v2  ;;  %493 = vmatprep.subr.bf16.mxu1 %v509_v2 }
   0xb   :  { %464 = vmatpush3.bf16.msra.mxu0 %v509_v2  ;;  %501 = vmatpush3.bf16.msra.mxu1 %v509_v2 }
   0xc   :  { %465 = vmatprep.subr.bf16.mxu0 %v510_v3  ;;  %494 = vmatprep.subr.bf16.mxu1 %v510_v3 }
   0xf   :  { %466 = vmatpush3.bf16.msra.mxu0 %v510_v3  ;;  %502 = vmatpush3.bf16.msra.mxu1 %v510_v3 }
  0x10   :  { %467 = vmatprep.subr.bf16.mxu0 %v511_v6  ;;  %495 = vmatprep.subr.bf16.mxu1 %v511_v6 }
  0x13   :  { %468 = vmatpush3.bf16.msra.mxu0 %v511_v6  ;;  %503 = vmatpush3.bf16.msra.mxu1 %v511_v6 }
  0x14   :  { %469 = vmatprep.subr.bf16.mxu0 %v512_v7  ;;  %496 = vmatprep.subr.bf16.mxu1 %v512_v7 }
  0x17   :  { %470 = vmatpush3.bf16.msra.mxu0 %v512_v7  ;;  %504 = vmatpush3.bf16.msra.mxu1 %v512_v7 }
  0x18   :  { %471 = vmatprep.subr.bf16.mxu0 %v513_v8  ;;  %497 = vmatprep.subr.bf16.mxu1 %v513_v8 }
  0x1b   :  { %472 = vmatpush3.bf16.msra.mxu0 %v513_v8  ;;  %505 = vmatpush3.bf16.msra.mxu1 %v513_v8 }
  0x1c   :  { %473 = vmatprep.subr.bf16.mxu0 %v514_v9  ;;  %498 = vmatprep.subr.bf16.mxu1 %v514_v9 }
  0x1f   :  { %474 = vmatpush3.bf16.msra.mxu0 %v514_v9  ;;  %506 = vmatpush3.bf16.msra.mxu1 %v514_v9 }
  0x22   :  { %476 = vmatmul.mubr.bf16.vlgmr.msra.gmra.mrb[0].mxu0 %v517_v10  ;;  %484 = vmatmul.mubr.bf16.vlgmr.msra.gmra.mrb[0].mxu1 %v518_v11 }
  0x23   :  { %479 = vmatprep.mubr.bf16.mxu0 %v519_v12  ;;  %487 = vmatprep.mubr.bf16.mxu1 %v520_v13 }
  0x2a   :  { %480 = vmatmul.mubr.bf16.gmra.mrb[4].mxu0 %v521_v14  ;;  %488 = vmatmul.mubr.bf16.gmra.mrb[4].mxu1 %v522_v15 }
  0xf5   :  { %v477_v17 = vpop.f32.mrb[0].mxu0  ;;  %v485_v18 = vpop.f32.mrb[0].mxu1 }
  0xf6   :  { %v193_v19 = vadd.f32 %v477_v17, %v347_v16  ;;  %v225_v20 = vadd.f32 %v485_v18, %v347_v16  ;;  %v184_v21 = vpop.f32.mrb[1].mxu0  ;;  %v216_v22 = vpop.f32.mrb[1].mxu1 }
  0xf7   :  { %v185_v23 = vadd.f32 %v347_v16, %v184_v21  ;;  %v217_v24 = vadd.f32 %v347_v16, %v216_v22  ;;  %v478_v25 = vpop.f32.mrb[2].mxu0  ;;  %v486_v26 = vpop.f32.mrb[2].mxu1 }
  0xf8   :  { %v196_v27 = vadd.f32 %v478_v25, %v347_v16  ;;  %v228_v28 = vadd.f32 %v486_v26, %v347_v16  ;;  %v187_v29 = vpop.f32.mrb[3].mxu0  ;;  %v219_v30 = vpop.f32.mrb[3].mxu1  ;;  %v249_v33 = vmax.f32 %v193_v19, 0.0  ;;  %v257_v34 = vmax.f32 %v225_v20, 0.0 }
  0xf9   :  { %v188_v31 = vadd.f32 %v347_v16, %v187_v29  ;;  %v220_v32 = vadd.f32 %v347_v16, %v219_v30  ;;  %v247_v37 = vmax.f32 %v185_v23, 0.0  ;;  %v255_v38 = vmax.f32 %v217_v24, 0.0 }
  0xfa   :  { %v250_v35 = vmax.f32 %v196_v27, 0.0  ;;  %v258_v36 = vmax.f32 %v228_v28, 0.0 }
  0xfb   :  { %v248_v39 = vmax.f32 %v188_v31, 0.0  ;;  %v256_v40 = vmax.f32 %v220_v32, 0.0 }
  0xfc   :  { %v404_v41 = vpack.c.bf16 %v250_v35, %v249_v33  ;;  %v424_v42 = vpack.c.bf16 %v258_v36, %v257_v34 }
  0xfd   :  { %v399_v43 = vpack.c.bf16 %v248_v39, %v247_v37  ;;  %v419_v44 = vpack.c.bf16 %v256_v40, %v255_v38  ;;  %v481_v45 = vpop.f32.mrb[4].mxu0  ;;  %v489_v46 = vpop.f32.mrb[4].mxu1 }
  0xfe   :  { %436 = vst [vmem:[%s621_s3 + $0x8] sm:$0xff] %v404_v41   ;;  %440 = vst [vmem:[%s621_s3 + $0x28] sm:$0xff] %v424_v42   ;;  %v209_v47 = vadd.f32 %v481_v45, %v347_v16  ;;  %v241_v48 = vadd.f32 %v489_v46, %v347_v16  ;;  %v200_v49 = vpop.f32.mrb[5].mxu0  ;;  %v232_v50 = vpop.f32.mrb[5].mxu1 }
  0xff   :  { %400 = vst [vmem:[%s621_s3] sm:$0xff] %v399_v43   ;;  %439 = vst [vmem:[%s621_s3 + $0x20] sm:$0xff] %v419_v44   ;;  %v201_v51 = vadd.f32 %v347_v16, %v200_v49  ;;  %v233_v52 = vadd.f32 %v347_v16, %v232_v50  ;;  %v482_v53 = vpop.f32.mrb[6].mxu0  ;;  %v490_v54 = vpop.f32.mrb[6].mxu1 }
 0x100   :  { %v212_v55 = vadd.f32 %v482_v53, %v347_v16  ;;  %v244_v56 = vadd.f32 %v490_v54, %v347_v16  ;;  %v203_v57 = vpop.f32.mrb[7].mxu0  ;;  %v235_v58 = vpop.f32.mrb[7].mxu1  ;;  %v253_v61 = vmax.f32 %v209_v47, 0.0  ;;  %v261_v62 = vmax.f32 %v241_v48, 0.0 }
 0x101   :  { %v204_v59 = vadd.f32 %v347_v16, %v203_v57  ;;  %v236_v60 = vadd.f32 %v347_v16, %v235_v58  ;;  %v251_v1 = vmax.f32 %v201_v51, 0.0  ;;  %v259_v2 = vmax.f32 %v233_v52, 0.0 }
 0x102   :  { %v254_v63 = vmax.f32 %v212_v55, 0.0  ;;  %v262_v0 = vmax.f32 %v244_v56, 0.0 }
 0x103   :  { %v252_v3 = vmax.f32 %v204_v59, 0.0  ;;  %v260_v4 = vmax.f32 %v236_v60, 0.0 }
 0x104   :  { %v414_v5 = vpack.c.bf16 %v254_v63, %v253_v61  ;;  %v434_v6 = vpack.c.bf16 %v262_v0, %v261_v62 }
 0x105   :  { %v409_v7 = vpack.c.bf16 %v252_v3, %v251_v1  ;;  %v429_v8 = vpack.c.bf16 %v260_v4, %v259_v2 }
 0x106   :  { %438 = vst [vmem:[%s621_s3 + $0x18] sm:$0xff] %v414_v5   ;;  %442 = vst [vmem:[%s621_s3 + $0x38] sm:$0xff] %v434_v6  }
 0x107   :  { %437 = vst [vmem:[%s621_s3 + $0x10] sm:$0xff] %v409_v7   ;;  %441 = vst [vmem:[%s621_s3 + $0x30] sm:$0xff] %v429_v8  }

// kernel: dqn_forward.7
= control target key start
LH: loop header
LB: loop body
LE: loop exit
PB: predicated region body
PF: predicated region fallthrough
CT: control target
= control target key end

     0   :  { %s1301_s1 = inlined_call_operand.vmem [shape: bf16[896,128], index: 1, kind: input, shape index: {}]   ;;  %s1302_s0 = inlined_call_operand.vmem [shape: bf16[32,896], index: 0, kind: input, shape index: {}]   ;;  %s1303_s2 = inlined_call_operand.vmem [shape: f32[1,128], index: 2, kind: input, shape index: {}]   ;;  %s1304_s3 = inlined_call_operand.vmem [shape: bf16[32,128], index: 3, kind: output, shape index: {}]  }
   0x1   :  { %v986_v0 = vld [vmem:[%s1301_s1 + $0x40] sm:$0xff]   ;;  %v990_v4 = vld [vmem:[%s1301_s1 + $0x48] sm:$0xff]   ;;  %v994_v8 = vld [vmem:[%s1301_s1 + $0x50] sm:$0xff]  }
   0x2   :  { %v987_v1 = vld [vmem:[%s1301_s1] sm:$0xff]   ;;  %872 = vmatprep.subr.bf16.mxu0 %v986_v0  ;;  %v991_v5 = vld [vmem:[%s1301_s1 + $0x8] sm:$0xff]   ;;  %v995_v9 = vld [vmem:[%s1301_s1 + $0x10] sm:$0xff]  }
   0x3   :  { %v988_v2 = vld [vmem:[%s1301_s1 + $0xc0] sm:$0xff]   ;;  %873 = vmatpush3.bf16.msra.mxu0 %v987_v1  ;;  %v992_v6 = vld [vmem:[%s1301_s1 + $0xc8] sm:$0xff]   ;;  %v996_v10 = vld [vmem:[%s1301_s1 + $0xd0] sm:$0xff]  }
   0x4   :  { %v989_v3 = vld [vmem:[%s1301_s1 + $0x80] sm:$0xff]   ;;  %900 = vmatprep.subr.bf16.mxu1 %v988_v2  ;;  %874 = vmatprep.subr.bf16.mxu0 %v990_v4  ;;  %v993_v7 = vld [vmem:[%s1301_s1 + $0x88] sm:$0xff]   ;;  %v997_v11 = vld [vmem:[%s1301_s1 + $0x90] sm:$0xff]  }
   0x5   :  { %901 = vmatpush3.bf16.msra.mxu1 %v989_v3  ;;  %v998_v12 = vld [vmem:[%s1301_s1 + $0x58] sm:$0xff]   ;;  %v1002_v16 = vld [vmem:[%s1301_s1 + $0x60] sm:$0xff]   ;;  %v1006_v20 = vld [vmem:[%s1301_s1 + $0x68] sm:$0xff]  }
   0x6   :  { %902 = vmatprep.subr.bf16.mxu1 %v992_v6  ;;  %v999_v13 = vld [vmem:[%s1301_s1 + $0x18] sm:$0xff]   ;;  %v1003_v17 = vld [vmem:[%s1301_s1 + $0x20] sm:$0xff]   ;;  %v1007_v21 = vld [vmem:[%s1301_s1 + $0x28] sm:$0xff]  }
   0x7   :  { %875 = vmatpush3.bf16.msra.mxu0 %v991_v5  ;;  %v1000_v14 = vld [vmem:[%s1301_s1 + $0xd8] sm:$0xff]   ;;  %v1004_v18 = vld [vmem:[%s1301_s1 + $0xe0] sm:$0xff]   ;;  %v1008_v22 = vld [vmem:[%s1301_s1 + $0xe8] sm:$0xff]  }
   0x8   :  { %876 = vmatprep.subr.bf16.mxu0 %v994_v8  ;;  %v1001_v15 = vld [vmem:[%s1301_s1 + $0x98] sm:$0xff]   ;;  %v1005_v19 = vld [vmem:[%s1301_s1 + $0xa0] sm:$0xff]   ;;  %v1009_v23 = vld [vmem:[%s1301_s1 + $0xa8] sm:$0xff]  }
   0x9   :  { %903 = vmatpush3.bf16.msra.mxu1 %v993_v7  ;;  %v1010_v24 = vld [vmem:[%s1301_s1 + $0x70] sm:$0xff]   ;;  %v1014_v28 = vld [vmem:[%s1301_s1 + $0x78] sm:$0xff]   ;;  %v1019_v32 = vld [vmem:[%s1302_s0 + $0x4] ss:$28 sps:$4 sm:$0xff]  }
   0xa   :  { %904 = vmatprep.subr.bf16.mxu1 %v996_v10  ;;  %v1011_v25 = vld [vmem:[%s1301_s1 + $0x30] sm:$0xff]   ;;  %v1015_v29 = vld [vmem:[%s1301_s1 + $0x38] sm:$0xff]   ;;  %590 = vmatprep.mubr.bf16.mxu0 %v1019_v32  ;;  %v1021_v34 = vld [vmem:[%s1301_s1 + $0x140] sm:$0xff]  }
   0xb   :  { %877 = vmatpush3.bf16.msra.mxu0 %v995_v9  ;;  %v1012_v26 = vld [vmem:[%s1301_s1 + $0xf0] sm:$0xff]   ;;  %v1016_v30 = vld [vmem:[%s1301_s1 + $0xf8] sm:$0xff]   ;;  %v1022_v35 = vld [vmem:[%s1302_s0 + $0x8] ss:$28 sps:$4 sm:$0xff]  }
   0xc   :  { %878 = vmatprep.subr.bf16.mxu0 %v998_v12  ;;  %v1013_v27 = vld [vmem:[%s1301_s1 + $0xb0] sm:$0xff]   ;;  %v1017_v31 = vld [vmem:[%s1302_s0] ss:$28 sps:$4 sm:$0xff]   ;;  %v1024_v36 = vld [vmem:[%s1302_s0 + $0xc] ss:$28 sps:$4 sm:$0xff]  }
   0xd   :  { %905 = vmatpush3.bf16.msra.mxu1 %v997_v11  ;;  %v1020_v33 = vld [vmem:[%s1301_s1 + $0xb8] sm:$0xff]   ;;  %v1025_v37 = vld [vmem:[%s1301_s1 + $0x100] sm:$0xff]   ;;  %639 = vmatprep.mubr.bf16.mxu1 %v1024_v36  ;;  %v1026_v38 = vld [vmem:[%s1301_s1 + $0x148] sm:$0xff]  }
   0xe   :  { %906 = vmatprep.subr.bf16.mxu1 %v1000_v14  ;;  %v1027_v39 = vld [vmem:[%s1301_s1 + $0x180] sm:$0xff]   ;;  %v1028_v40 = vld [vmem:[%s1301_s1 + $0x108] sm:$0xff]   ;;  %v1029_v41 = vld [vmem:[%s1301_s1 + $0x150] sm:$0xff]  }
   0xf   :  { %879 = vmatpush3.bf16.msra.mxu0 %v999_v13  ;;  %v1030_v42 = vld [vmem:[%s1301_s1 + $0x188] sm:$0xff]   ;;  %v1031_v43 = vld [vmem:[%s1301_s1 + $0x110] sm:$0xff]   ;;  %v1032_v44 = vld [vmem:[%s1301_s1 + $0x158] sm:$0xff]  }
  0x10   :  { %880 = vmatprep.subr.bf16.mxu0 %v1002_v16  ;;  %v1033_v45 = vld [vmem:[%s1301_s1 + $0x190] sm:$0xff]   ;;  %v1034_v46 = vld [vmem:[%s1301_s1 + $0x118] sm:$0xff]   ;;  %v1035_v47 = vld [vmem:[%s1301_s1 + $0x160] sm:$0xff]  }
  0x11   :  { %907 = vmatpush3.bf16.msra.mxu1 %v1001_v15  ;;  %v1036_v48 = vld [vmem:[%s1301_s1 + $0x198] sm:$0xff]   ;;  %v1037_v49 = vld [vmem:[%s1301_s1 + $0x120] sm:$0xff]   ;;  %v1040_v51 = vld [vmem:[%s1301_s1 + $0x168] sm:$0xff]  }
  0x12   :  { %908 = vmatprep.subr.bf16.mxu1 %v1004_v18  ;;  %v1038_v50 = vld [vmem:[%s1302_s0 + $0x3c] ss:$28 sps:$4 sm:$0xff]   ;;  %v1041_v52 = vld [vmem:[%s1301_s1 + $0x1a0] sm:$0xff]   ;;  %v1043_v54 = vld [vmem:[%s1301_s1 + $0x128] sm:$0xff]  }
  0x13   :  { %881 = vmatpush3.bf16.msra.mxu0 %v1003_v17  ;;  %v1042_v53 = vld [vmem:[%s1302_s0 + $0x38] ss:$28 sps:$4 sm:$0xff]   ;;  %v1044_v55 = vld [vmem:[%s1302_s0 + $0x44] ss:$28 sps:$4 sm:$0xff]   ;;  %v1048_v58 = vld [vmem:[%s1301_s1 + $0x1a8] sm:$0xff]  }
  0x14   :  { %882 = vmatprep.subr.bf16.mxu0 %v1006_v20  ;;  %v1046_v56 = vld [vmem:[%s1302_s0 + $0x40] ss:$28 sps:$4 sm:$0xff]   ;;  %v1047_v57 = vld [vmem:[%s1301_s1 + $0x170] sm:$0xff]   ;;  %v1059_v3 = vld [vmem:[%s1302_s0 + $0x4c] ss:$28 sps:$4 sm:$0xff]  }
  0x15   :  { %909 = vmatpush3.bf16.msra.mxu1 %v1005_v19  ;;  %v1049_v59 = vld [vmem:[%s1301_s1 + $0x130] sm:$0xff]   ;;  %v1050_v60 = vld [vmem:[%s1301_s1 + $0x178] sm:$0xff]   ;;  %v1061_v5 = vld [vmem:[%s1302_s0 + $0x48] ss:$28 sps:$4 sm:$0xff]  }
  0x16   :  { %910 = vmatprep.subr.bf16.mxu1 %v1008_v22  ;;  %v1051_v61 = vld [vmem:[%s1301_s1 + $0x1b0] sm:$0xff]   ;;  %v1052_v62 = vld [vmem:[%s1301_s1 + $0x138] sm:$0xff]   ;;  %v782_v7 = vld [vmem:[%s1303_s2] ss:$0 sm:$0xff] }
  0x17   :  { %883 = vmatpush3.bf16.msra.mxu0 %v1007_v21  ;;  %v1055_v63 = vld [vmem:[%s1302_s0 + $0x14] ss:$28 sps:$4 sm:$0xff]   ;;  %v1056_v0 = vld [vmem:[%s1301_s1 + $0x1b8] sm:$0xff]  }
  0x18   :  { %884 = vmatprep.subr.bf16.mxu0 %v1010_v24  ;;  %v1057_v1 = vld [vmem:[%s1302_s0 + $0x18] ss:$28 sps:$4 sm:$0xff]   ;;  %v1053_v2 = vld [vmem:[%s1302_s0 + $0x10] ss:$28 sps:$4 sm:$0xff]  }
  0x19   :  { %911 = vmatpush3.bf16.msra.mxu1 %v1009_v23  ;;  %v1058_v4 = vld [vmem:[%s1302_s0 + $0x50] ss:$28 sps:$4 sm:$0xff]  }
  0x1a   :  { %912 = vmatprep.subr.bf16.mxu1 %v1012_v26 }
  0x1b   :  { %885 = vmatpush3.bf16.msra.mxu0 %v1011_v25 }
  0x1c   :  { %886 = vmatprep.subr.bf16.mxu0 %v1014_v28 }
  0x1d   :  { %913 = vmatpush3.bf16.msra.mxu1 %v1013_v27 }
  0x1e   :  { %914 = vmatprep.subr.bf16.mxu1 %v1016_v30 }
  0x1f   :  { %887 = vmatpush3.bf16.msra.mxu0 %v1015_v29 }
  0x20   :  { %928 = vmatprep.subr.bf16.mxu0 %v1021_v34 }
  0x21   :  { %915 = vmatpush3.bf16.msra.mxu1 %v1020_v33 }
  0x22   :  { %591 = vmatmul.mubr.bf16.vlgmr.msra.gmra.mrb[0].mxu0 %v1017_v31  ;;  %966 = vmatprep.subr.bf16.mxu1 %v1027_v39 }
  0x23   :  { %929 = vmatpush3.bf16.msra.mxu0 %v1025_v37  ;;  %598 = vmatprep.mubr.bf16.mxu0 %v1038_v50 }
  0x24   :  { %640 = vmatmul.mubr.bf16.vlgmr.msra.gmra.mrb[0].mxu1 %v1022_v35  ;;  %930 = vmatprep.subr.bf16.mxu0 %v1026_v38 }
  0x25   :  { %967 = vmatpush3.bf16.msra.mxu1 %v1027_v39  ;;  %647 = vmatprep.mubr.bf16.mxu1 %v1044_v55 }
  0x26   :  { %968 = vmatprep.subr.bf16.mxu1 %v1030_v42 }
  0x27   :  { %931 = vmatpush3.bf16.msra.mxu0 %v1028_v40 }
  0x28   :  { %932 = vmatprep.subr.bf16.mxu0 %v1029_v41 }
  0x29   :  { %969 = vmatpush3.bf16.msra.mxu1 %v1030_v42 }
  0x2a   :  { %970 = vmatprep.subr.bf16.mxu1 %v1033_v45  ;;  %599 = vmatmul.mubr.bf16.gmra.mrb[4].mxu0 %v1042_v53 }
  0x2b   :  { %933 = vmatpush3.bf16.msra.mxu0 %v1031_v43  ;;  %688 = vmatprep.mubr.bf16.mxu0 %v1055_v63 }
  0x2c   :  { %934 = vmatprep.subr.bf16.mxu0 %v1032_v44  ;;  %648 = vmatmul.mubr.bf16.gmra.mrb[4].mxu1 %v1046_v56 }
  0x2d   :  { %971 = vmatpush3.bf16.msra.mxu1 %v1033_v45  ;;  %982 = vmatprep.mubr.bf16.mxu1 %v1057_v1 }
  0x2e   :  { %972 = vmatprep.subr.bf16.mxu1 %v1036_v48 }
  0x2f   :  { %935 = vmatpush3.bf16.msra.mxu0 %v1034_v46 }
  0x30   :  { %936 = vmatprep.subr.bf16.mxu0 %v1035_v47 }
  0x31   :  { %973 = vmatpush3.bf16.msra.mxu1 %v1036_v48 }
  0x32   :  { %974 = vmatprep.subr.bf16.mxu1 %v1041_v52 }
  0x33   :  { %937 = vmatpush3.bf16.msra.mxu0 %v1037_v49 }
  0x34   :  { %938 = vmatprep.subr.bf16.mxu0 %v1040_v51 }
  0x35   :  { %975 = vmatpush3.bf16.msra.mxu1 %v1041_v52 }
  0x36   :  { %976 = vmatprep.subr.bf16.mxu1 %v1048_v58 }
  0x37   :  { %939 = vmatpush3.bf16.msra.mxu0 %v1043_v54 }
  0x38   :  { %940 = vmatprep.subr.bf16.mxu0 %v1047_v57 }
  0x39   :  { %977 = vmatpush3.bf16.msra.mxu1 %v1048_v58 }
  0x3a   :  { %978 = vmatprep.subr.bf16.mxu1 %v1051_v61 }
  0x3b   :  { %941 = vmatpush3.bf16.msra.mxu0 %v1049_v59 }
  0x3c   :  { %942 = vmatprep.subr.bf16.mxu0 %v1050_v60 }
  0x3d   :  { %979 = vmatpush3.bf16.msra.mxu1 %v1051_v61 }
  0x3e   :  { %980 = vmatprep.subr.bf16.mxu1 %v1056_v0 }
  0x3f   :  { %943 = vmatpush3.bf16.msra.mxu0 %v1052_v62 }
  0x41   :  { %981 = vmatpush3.bf16.msra.mxu1 %v1056_v0 }
  0x42   :  { %689 = vmatmul.mubr.bf16.vlgmr.msra.gmra.mrb[8].mxu0 %v1053_v2 }
  0x43   :  { %696 = vmatprep.mubr.bf16.mxu0 %v1059_v3 }
  0x44   :  { %983 = vmatmul.mubr.bf16.vlgmr.msra.gmra.mrb[8].mxu1 %v1058_v4 }
  0x4a   :  { %697 = vmatmul.mubr.bf16.gmra.mrb[12].mxu0 %v1061_v5 }
  0xf5   :  { %v888_v6 = vpop.f32.mrb[0].mxu0 }
  0xf6   :  { %v889_v8 = vpop.f32.mrb[1].mxu0 }
  0xf7   :  { %v890_v9 = vadd.f32 %v889_v8, %v888_v6  ;;  %v891_v10 = vpop.f32.mrb[2].mxu0  ;;  %v916_v11 = vpop.f32.mrb[0].mxu1 }
  0xf8   :  { %v892_v12 = vpop.f32.mrb[3].mxu0  ;;  %v917_v15 = vpop.f32.mrb[1].mxu1 }
  0xf9   :  { %v593_v13 = vadd.f32 %v890_v9, %v782_v7  ;;  %v893_v14 = vadd.f32 %v892_v12, %v891_v10  ;;  %v918_v16 = vadd.f32 %v917_v15, %v916_v11  ;;  %v919_v17 = vpop.f32.mrb[2].mxu1 }
  0xfa   :  { %v920_v19 = vpop.f32.mrb[3].mxu1 }
  0xfb   :  { %v596_v18 = vadd.f32 %v893_v14, %v782_v7  ;;  %v642_v20 = vadd.f32 %v918_v16, %v593_v13  ;;  %v921_v21 = vadd.f32 %v920_v19, %v919_v17 }
  0xfd   :  { %v645_v22 = vadd.f32 %v921_v21, %v596_v18  ;;  %v894_v23 = vpop.f32.mrb[4].mxu0 }
  0xfe   :  { %v895_v24 = vpop.f32.mrb[5].mxu0 }
  0xff   :  { %v896_v25 = vadd.f32 %v895_v24, %v894_v23  ;;  %v897_v26 = vpop.f32.mrb[6].mxu0  ;;  %v922_v27 = vpop.f32.mrb[4].mxu1 }
 0x100   :  { %v898_v28 = vpop.f32.mrb[7].mxu0  ;;  %v923_v31 = vpop.f32.mrb[5].mxu1 }
 0x101   :  { %v601_v29 = vadd.f32 %v896_v25, %v782_v7  ;;  %v899_v30 = vadd.f32 %v898_v28, %v897_v26  ;;  %v924_v32 = vadd.f32 %v923_v31, %v922_v27  ;;  %v925_v33 = vpop.f32.mrb[6].mxu1 }
 0x102   :  { %v926_v35 = vpop.f32.mrb[7].mxu1 }
 0x103   :  { %v604_v34 = vadd.f32 %v899_v30, %v782_v7  ;;  %v650_v36 = vadd.f32 %v924_v32, %v601_v29  ;;  %v927_v37 = vadd.f32 %v926_v35, %v925_v33 }
 0x105   :  { %v653_v38 = vadd.f32 %v927_v37, %v604_v34 }
 0x115   :  { %v944_v39 = vpop.f32.mrb[8].mxu0 }
 0x116   :  { %v945_v40 = vpop.f32.mrb[9].mxu0 }
 0x117   :  { %v946_v41 = vadd.f32 %v945_v40, %v944_v39  ;;  %v947_v42 = vpop.f32.mrb[10].mxu0  ;;  %v984_v44 = vpop.f32.mrb[8].mxu1 }
 0x118   :  { %v948_v43 = vpop.f32.mrb[11].mxu0  ;;  %v739_v47 = vpop.f32.mrb[9].mxu1 }
 0x119   :  { %v949_v45 = vadd.f32 %v948_v43, %v947_v42  ;;  %v691_v46 = vadd.f32 %v946_v41, %v642_v20  ;;  %v985_v48 = vpop.f32.mrb[10].mxu1 }
 0x11a   :  { %v742_v51 = vpop.f32.mrb[11].mxu1 }
 0x11b   :  { %v740_v49 = vadd.f32 %v739_v47, %v691_v46  ;;  %v694_v50 = vadd.f32 %v949_v45, %v645_v22 }
 0x11d   :  { %v743_v52 = vadd.f32 %v742_v51, %v694_v50  ;;  %v950_v53 = vpop.f32.mrb[12].mxu0  ;;  %v754_v55 = vmax.f32 %v740_v49, 0.0 }
 0x11e   :  { %v951_v54 = vpop.f32.mrb[13].mxu0 }
 0x11f   :  { %v755_v56 = vmax.f32 %v743_v52, 0.0  ;;  %v952_v57 = vadd.f32 %v951_v54, %v950_v53  ;;  %v953_v58 = vpop.f32.mrb[14].mxu0 }
 0x120   :  { %v954_v59 = vpop.f32.mrb[15].mxu0 }
 0x121   :  { %v864_v60 = vpack.c.bf16 %v755_v56, %v754_v55  ;;  %v699_v61 = vadd.f32 %v952_v57, %v650_v36  ;;  %v955_v62 = vadd.f32 %v954_v59, %v953_v58 }
 0x123   :  { %865 = vst [vmem:[%s1304_s3] sm:$0xff] %v864_v60   ;;  %v748_v63 = vadd.f32 %v984_v44, %v699_v61  ;;  %v702_v0 = vadd.f32 %v955_v62, %v653_v38 }
 0x125   :  { %v751_v1 = vadd.f32 %v985_v48, %v702_v0  ;;  %v756_v2 = vmax.f32 %v748_v63, 0.0 }
 0x127   :  { %v757_v3 = vmax.f32 %v751_v1, 0.0 }
 0x129   :  { %v869_v4 = vpack.c.bf16 %v757_v3, %v756_v2 }
 0x12b   :  { %871 = vst [vmem:[%s1304_s3 + $0x8] sm:$0xff] %v869_v4  }

// kernel: dqn_forward.8
= control target key start
LH: loop header
LB: loop body
LE: loop exit
PB: predicated region body
PF: predicated region fallthrough
CT: control target
= control target key end

     0   :  { %s1544_s1 = inlined_call_operand.vmem [shape: bf16[1280,128], index: 1, kind: input, shape index: {}]   ;;  %s1545_s0 = inlined_call_operand.vmem [shape: bf16[16,1280], index: 0, kind: input, shape index: {}]   ;;  %s1546_s2 = inlined_call_operand.vmem [shape: f32[1,128], index: 2, kind: input, shape index: {}]   ;;  %s1547_s3 = inlined_call_operand.vmem [shape: bf16[16,128], index: 3, kind: output, shape index: {}]  }
   0x1   :  { %v1153_v0 = vld [vmem:[%s1544_s1 + $0x40] sm:$0xff]   ;;  %v1157_v4 = vld [vmem:[%s1544_s1 + $0x48] sm:$0xff]   ;;  %v1161_v8 = vld [vmem:[%s1544_s1 + $0x50] sm:$0xff]  }
   0x2   :  { %v1154_v1 = vld [vmem:[%s1544_s1] sm:$0xff]   ;;  %1043 = vmatprep.subr.bf16.mxu0 %v1153_v0  ;;  %v1158_v5 = vld [vmem:[%s1544_s1 + $0x8] sm:$0xff]   ;;  %v1162_v9 = vld [vmem:[%s1544_s1 + $0x10] sm:$0xff]  }
   0x3   :  { %v1155_v2 = vld [vmem:[%s1544_s1 + $0xc0] sm:$0xff]   ;;  %1044 = vmatpush3.bf16.msra.mxu0 %v1154_v1  ;;  %v1159_v6 = vld [vmem:[%s1544_s1 + $0xc8] sm:$0xff]   ;;  %v1163_v10 = vld [vmem:[%s1544_s1 + $0xd0] sm:$0xff]  }
   0x4   :  { %v1156_v3 = vld [vmem:[%s1544_s1 + $0x80] sm:$0xff]   ;;  %1065 = vmatprep.subr.bf16.mxu1 %v1155_v2  ;;  %1045 = vmatprep.subr.bf16.mxu0 %v1157_v4  ;;  %v1160_v7 = vld [vmem:[%s1544_s1 + $0x88] sm:$0xff]   ;;  %v1164_v11 = vld [vmem:[%s1544_s1 + $0x90] sm:$0xff]  }
   0x5   :  { %1066 = vmatpush3.bf16.msra.mxu1 %v1156_v3  ;;  %v1165_v12 = vld [vmem:[%s1544_s1 + $0x58] sm:$0xff]   ;;  %v1169_v16 = vld [vmem:[%s1544_s1 + $0x60] sm:$0xff]   ;;  %v1173_v20 = vld [vmem:[%s1544_s1 + $0x68] sm:$0xff]  }
   0x6   :  { %1067 = vmatprep.subr.bf16.mxu1 %v1159_v6  ;;  %v1166_v13 = vld [vmem:[%s1544_s1 + $0x18] sm:$0xff]   ;;  %v1170_v17 = vld [vmem:[%s1544_s1 + $0x20] sm:$0xff]   ;;  %v1174_v21 = vld [vmem:[%s1544_s1 + $0x28] sm:$0xff]  }
   0x7   :  { %1046 = vmatpush3.bf16.msra.mxu0 %v1158_v5  ;;  %v1167_v14 = vld [vmem:[%s1544_s1 + $0xd8] sm:$0xff]   ;;  %v1171_v18 = vld [vmem:[%s1544_s1 + $0xe0] sm:$0xff]   ;;  %v1175_v22 = vld [vmem:[%s1544_s1 + $0xe8] sm:$0xff]  }
   0x8   :  { %1047 = vmatprep.subr.bf16.mxu0 %v1161_v8  ;;  %v1168_v15 = vld [vmem:[%s1544_s1 + $0x98] sm:$0xff]   ;;  %v1172_v19 = vld [vmem:[%s1544_s1 + $0xa0] sm:$0xff]   ;;  %v1176_v23 = vld [vmem:[%s1544_s1 + $0xa8] sm:$0xff]  }
   0x9   :  { %1068 = vmatpush3.bf16.msra.mxu1 %v1160_v7  ;;  %v1177_v24 = vld [vmem:[%s1544_s1 + $0x70] sm:$0xff]   ;;  %v1181_v28 = vld [vmem:[%s1544_s1 + $0x78] sm:$0xff]   ;;  %v1184_v31 = vld [vmem:[%s1545_s0] ss:$40 sps:$4 sm:$0xff]  }
   0xa   :  { %1069 = vmatprep.subr.bf16.mxu1 %v1163_v10  ;;  %v1178_v25 = vld [vmem:[%s1544_s1 + $0x30] sm:$0xff]   ;;  %v1182_v29 = vld [vmem:[%s1544_s1 + $0x38] sm:$0xff]   ;;  %v1186_v32 = vld [vmem:[%s1545_s0 + $0x4] ss:$40 sps:$4 sm:$0xff]  }
   0xb   :  { %1048 = vmatpush3.bf16.msra.mxu0 %v1162_v9  ;;  %v1179_v26 = vld [vmem:[%s1544_s1 + $0xf0] sm:$0xff]   ;;  %v1183_v30 = vld [vmem:[%s1544_s1 + $0xf8] sm:$0xff]   ;;  %754 = vmatprep.mubr.bf16.mxu0 %v1186_v32  ;;  %v1188_v34 = vld [vmem:[%s1544_s1 + $0x140] sm:$0xff]  }
   0xc   :  { %1049 = vmatprep.subr.bf16.mxu0 %v1165_v12  ;;  %v1180_v27 = vld [vmem:[%s1544_s1 + $0xb0] sm:$0xff]   ;;  %v1187_v33 = vld [vmem:[%s1544_s1 + $0xb8] sm:$0xff]   ;;  %v1192_v37 = vld [vmem:[%s1544_s1 + $0x100] sm:$0xff]  }
   0xd   :  { %1070 = vmatpush3.bf16.msra.mxu1 %v1164_v11  ;;  %v1189_v35 = vld [vmem:[%s1545_s0 + $0x8] ss:$40 sps:$4 sm:$0xff]   ;;  %v1191_v36 = vld [vmem:[%s1545_s0 + $0xc] ss:$40 sps:$4 sm:$0xff]   ;;  %v1193_v38 = vld [vmem:[%s1544_s1 + $0x1c0] sm:$0xff]  }
   0xe   :  { %1071 = vmatprep.subr.bf16.mxu1 %v1167_v14  ;;  %795 = vmatprep.mubr.bf16.mxu1 %v1191_v36  ;;  %v1194_v39 = vld [vmem:[%s1544_s1 + $0x180] sm:$0xff]   ;;  %v1195_v40 = vld [vmem:[%s1544_s1 + $0x148] sm:$0xff]   ;;  %v1199_v44 = vld [vmem:[%s1544_s1 + $0x150] sm:$0xff]  }
   0xf   :  { %1050 = vmatpush3.bf16.msra.mxu0 %v1166_v13  ;;  %v1196_v41 = vld [vmem:[%s1544_s1 + $0x108] sm:$0xff]   ;;  %v1200_v45 = vld [vmem:[%s1544_s1 + $0x110] sm:$0xff]   ;;  %v1203_v48 = vld [vmem:[%s1544_s1 + $0x158] sm:$0xff]  }
  0x10   :  { %1051 = vmatprep.subr.bf16.mxu0 %v1169_v16  ;;  %v1197_v42 = vld [vmem:[%s1544_s1 + $0x1c8] sm:$0xff]   ;;  %v1201_v46 = vld [vmem:[%s1544_s1 + $0x1d0] sm:$0xff]   ;;  %v1204_v49 = vld [vmem:[%s1544_s1 + $0x118] sm:$0xff]  }
  0x11   :  { %1072 = vmatpush3.bf16.msra.mxu1 %v1168_v15  ;;  %v1198_v43 = vld [vmem:[%s1544_s1 + $0x188] sm:$0xff]   ;;  %v1202_v47 = vld [vmem:[%s1544_s1 + $0x190] sm:$0xff]   ;;  %v1205_v50 = vld [vmem:[%s1544_s1 + $0x1d8] sm:$0xff]  }
  0x12   :  { %1073 = vmatprep.subr.bf16.mxu1 %v1171_v18  ;;  %v1206_v51 = vld [vmem:[%s1544_s1 + $0x198] sm:$0xff]   ;;  %v1207_v52 = vld [vmem:[%s1544_s1 + $0x160] sm:$0xff]   ;;  %v1211_v56 = vld [vmem:[%s1544_s1 + $0x168] sm:$0xff]  }
  0x13   :  { %1052 = vmatpush3.bf16.msra.mxu0 %v1170_v17  ;;  %v1208_v53 = vld [vmem:[%s1544_s1 + $0x120] sm:$0xff]   ;;  %v1212_v57 = vld [vmem:[%s1544_s1 + $0x128] sm:$0xff]   ;;  %v1215_v60 = vld [vmem:[%s1544_s1 + $0x170] sm:$0xff]  }
  0x14   :  { %1053 = vmatprep.subr.bf16.mxu0 %v1173_v20  ;;  %v1209_v54 = vld [vmem:[%s1544_s1 + $0x1e0] sm:$0xff]   ;;  %v1213_v58 = vld [vmem:[%s1544_s1 + $0x1e8] sm:$0xff]   ;;  %v1216_v61 = vld [vmem:[%s1544_s1 + $0x130] sm:$0xff]  }
  0x15   :  { %1074 = vmatpush3.bf16.msra.mxu1 %v1172_v19  ;;  %v1210_v55 = vld [vmem:[%s1544_s1 + $0x1a0] sm:$0xff]   ;;  %v1214_v59 = vld [vmem:[%s1544_s1 + $0x1a8] sm:$0xff]   ;;  %v1217_v62 = vld [vmem:[%s1544_s1 + $0x1f0] sm:$0xff]  }
  0x16   :  { %1075 = vmatprep.subr.bf16.mxu1 %v1175_v22  ;;  %v1218_v63 = vld [vmem:[%s1544_s1 + $0x1b0] sm:$0xff]   ;;  %v1219_v0 = vld [vmem:[%s1544_s1 + $0x178] sm:$0xff]   ;;  %v1226_v6 = vld [vmem:[%s1544_s1 + $0x240] sm:$0xff]  }
  0x17   :  { %1054 = vmatpush3.bf16.msra.mxu0 %v1174_v21  ;;  %v1220_v1 = vld [vmem:[%s1544_s1 + $0x138] sm:$0xff]   ;;  %v1230_v9 = vld [vmem:[%s1544_s1 + $0x200] sm:$0xff]   ;;  %v1231_v10 = vld [vmem:[%s1544_s1 + $0x248] sm:$0xff]  }
  0x18   :  { %1055 = vmatprep.subr.bf16.mxu0 %v1177_v24  ;;  %v1221_v2 = vld [vmem:[%s1544_s1 + $0x1f8] sm:$0xff]   ;;  %v1232_v11 = vld [vmem:[%s1544_s1 + $0x208] sm:$0xff]   ;;  %v1233_v12 = vld [vmem:[%s1544_s1 + $0x250] sm:$0xff]  }
  0x19   :  { %1076 = vmatpush3.bf16.msra.mxu1 %v1176_v23  ;;  %v1222_v3 = vld [vmem:[%s1545_s0 + $0x10] ss:$40 sps:$4 sm:$0xff]   ;;  %v1224_v4 = vld [vmem:[%s1545_s0 + $0x14] ss:$40 sps:$4 sm:$0xff]   ;;  %v1237_v16 = vld [vmem:[%s1544_s1 + $0x260] sm:$0xff]  }
  0x1a   :  { %1077 = vmatprep.subr.bf16.mxu1 %v1179_v26  ;;  %v1225_v5 = vld [vmem:[%s1544_s1 + $0x1b8] sm:$0xff]   ;;  %v1234_v13 = vld [vmem:[%s1544_s1 + $0x210] sm:$0xff]   ;;  %v1238_v17 = vld [vmem:[%s1544_s1 + $0x220] sm:$0xff]  }
  0x1b   :  { %1056 = vmatpush3.bf16.msra.mxu0 %v1178_v25  ;;  %v1227_v7 = vld [vmem:[%s1545_s0 + $0x18] ss:$40 sps:$4 sm:$0xff]   ;;  %v1229_v8 = vld [vmem:[%s1545_s0 + $0x1c] ss:$40 sps:$4 sm:$0xff]   ;;  %v1239_v18 = vld [vmem:[%s1544_s1 + $0x268] sm:$0xff]  }
  0x1c   :  { %1057 = vmatprep.subr.bf16.mxu0 %v1181_v28  ;;  %v1235_v14 = vld [vmem:[%s1544_s1 + $0x258] sm:$0xff]   ;;  %v1247_v19 = vld [vmem:[%s1545_s0 + $0x24] ss:$40 sps:$4 sm:$0xff]   ;;  %v1241_v21 = vld [vmem:[%s1544_s1 + $0x270] sm:$0xff]  }
  0x1d   :  { %1078 = vmatpush3.bf16.msra.mxu1 %v1180_v27  ;;  %v1236_v15 = vld [vmem:[%s1544_s1 + $0x218] sm:$0xff]   ;;  %v1240_v20 = vld [vmem:[%s1544_s1 + $0x228] sm:$0xff]   ;;  %v1242_v22 = vld [vmem:[%s1544_s1 + $0x230] sm:$0xff]  }
  0x1e   :  { %1079 = vmatprep.subr.bf16.mxu1 %v1183_v30  ;;  %v1243_v23 = vld [vmem:[%s1544_s1 + $0x278] sm:$0xff]   ;;  %v1245_v25 = vld [vmem:[%s1545_s0 + $0x20] ss:$40 sps:$4 sm:$0xff]  }
  0x1f   :  { %1058 = vmatpush3.bf16.msra.mxu0 %v1182_v29  ;;  %v1244_v24 = vld [vmem:[%s1544_s1 + $0x238] sm:$0xff]   ;;  %v943_v27 = vld [vmem:[%s1546_s2] ss:$0 sm:$0xff] }
  0x20   :  { %1087 = vmatprep.subr.bf16.mxu0 %v1188_v34 }
  0x21   :  { %1080 = vmatpush3.bf16.msra.mxu1 %v1187_v33 }
  0x22   :  { %755 = vmatmul.mubr.bf16.vlgmr.msra.gmra.mrb[0].mxu0 %v1184_v31  ;;  %1109 = vmatprep.subr.bf16.mxu1 %v1193_v38 }
  0x23   :  { %1088 = vmatpush3.bf16.msra.mxu0 %v1192_v37  ;;  %836 = vmatprep.mubr.bf16.mxu0 %v1224_v4 }
  0x24   :  { %796 = vmatmul.mubr.bf16.vlgmr.msra.gmra.mrb[0].mxu1 %v1189_v35  ;;  %1089 = vmatprep.subr.bf16.mxu0 %v1195_v40 }
  0x25   :  { %1110 = vmatpush3.bf16.msra.mxu1 %v1194_v39  ;;  %877 = vmatprep.mubr.bf16.mxu1 %v1229_v8 }
  0x26   :  { %1111 = vmatprep.subr.bf16.mxu1 %v1197_v42 }
  0x27   :  { %1090 = vmatpush3.bf16.msra.mxu0 %v1196_v41 }
  0x28   :  { %1091 = vmatprep.subr.bf16.mxu0 %v1199_v44 }
  0x29   :  { %1112 = vmatpush3.bf16.msra.mxu1 %v1198_v43 }
  0x2a   :  { %1113 = vmatprep.subr.bf16.mxu1 %v1201_v46 }
  0x2b   :  { %1092 = vmatpush3.bf16.msra.mxu0 %v1200_v45 }
  0x2c   :  { %1093 = vmatprep.subr.bf16.mxu0 %v1203_v48 }
  0x2d   :  { %1114 = vmatpush3.bf16.msra.mxu1 %v1202_v47 }
  0x2e   :  { %1115 = vmatprep.subr.bf16.mxu1 %v1205_v50 }
  0x2f   :  { %1094 = vmatpush3.bf16.msra.mxu0 %v1204_v49 }
  0x30   :  { %1095 = vmatprep.subr.bf16.mxu0 %v1207_v52 }
  0x31   :  { %1116 = vmatpush3.bf16.msra.mxu1 %v1206_v51 }
  0x32   :  { %1117 = vmatprep.subr.bf16.mxu1 %v1209_v54 }
  0x33   :  { %1096 = vmatpush3.bf16.msra.mxu0 %v1208_v53 }
  0x34   :  { %1097 = vmatprep.subr.bf16.mxu0 %v1211_v56 }
  0x35   :  { %1118 = vmatpush3.bf16.msra.mxu1 %v1210_v55 }
  0x36   :  { %1119 = vmatprep.subr.bf16.mxu1 %v1213_v58 }
  0x37   :  { %1098 = vmatpush3.bf16.msra.mxu0 %v1212_v57 }
  0x38   :  { %1099 = vmatprep.subr.bf16.mxu0 %v1215_v60 }
  0x39   :  { %1120 = vmatpush3.bf16.msra.mxu1 %v1214_v59 }
  0x3a   :  { %1121 = vmatprep.subr.bf16.mxu1 %v1217_v62 }
  0x3b   :  { %1100 = vmatpush3.bf16.msra.mxu0 %v1216_v61 }
  0x3c   :  { %1101 = vmatprep.subr.bf16.mxu0 %v1219_v0 }
  0x3d   :  { %1122 = vmatpush3.bf16.msra.mxu1 %v1218_v63 }
  0x3e   :  { %1123 = vmatprep.subr.bf16.mxu1 %v1221_v2 }
  0x3f   :  { %1102 = vmatpush3.bf16.msra.mxu0 %v1220_v1 }
  0x40   :  { %1131 = vmatprep.subr.bf16.mxu0 %v1226_v6 }
  0x41   :  { %1124 = vmatpush3.bf16.msra.mxu1 %v1225_v5 }
  0x42   :  { %837 = vmatmul.mubr.bf16.vlgmr.msra.gmra.mrb[4].mxu0 %v1222_v3 }
  0x43   :  { %1132 = vmatpush3.bf16.msra.mxu0 %v1230_v9  ;;  %918 = vmatprep.mubr.bf16.mxu0 %v1247_v19 }
  0x44   :  { %878 = vmatmul.mubr.bf16.vlgmr.msra.gmra.mrb[4].mxu1 %v1227_v7  ;;  %1133 = vmatprep.subr.bf16.mxu0 %v1231_v10 }
  0x47   :  { %1134 = vmatpush3.bf16.msra.mxu0 %v1232_v11 }
  0x48   :  { %1135 = vmatprep.subr.bf16.mxu0 %v1233_v12 }
  0x4b   :  { %1136 = vmatpush3.bf16.msra.mxu0 %v1234_v13 }
  0x4c   :  { %1137 = vmatprep.subr.bf16.mxu0 %v1235_v14 }
  0x4f   :  { %1138 = vmatpush3.bf16.msra.mxu0 %v1236_v15 }
  0x50   :  { %1139 = vmatprep.subr.bf16.mxu0 %v1237_v16 }
  0x53   :  { %1140 = vmatpush3.bf16.msra.mxu0 %v1238_v17 }
  0x54   :  { %1141 = vmatprep.subr.bf16.mxu0 %v1239_v18 }
  0x57   :  { %1142 = vmatpush3.bf16.msra.mxu0 %v1240_v20 }
  0x58   :  { %1143 = vmatprep.subr.bf16.mxu0 %v1241_v21 }
  0x5b   :  { %1144 = vmatpush3.bf16.msra.mxu0 %v1242_v22 }
  0x5c   :  { %1145 = vmatprep.subr.bf16.mxu0 %v1243_v23 }
  0x5f   :  { %1146 = vmatpush3.bf16.msra.mxu0 %v1244_v24 }
  0x62   :  { %919 = vmatmul.mubr.bf16.vlgmr.msra.gmra.mrb[8].mxu0 %v1245_v25 }
  0xf5   :  { %v1059_v26 = vpop.f32.mrb[0].mxu0 }
  0xf6   :  { %v1060_v28 = vpop.f32.mrb[1].mxu0 }
  0xf7   :  { %v1061_v29 = vadd.f32 %v1060_v28, %v1059_v26  ;;  %v1062_v30 = vpop.f32.mrb[2].mxu0  ;;  %v1081_v31 = vpop.f32.mrb[0].mxu1 }
  0xf8   :  { %v1063_v32 = vpop.f32.mrb[3].mxu0  ;;  %v1082_v35 = vpop.f32.mrb[1].mxu1 }
  0xf9   :  { %v757_v33 = vadd.f32 %v1061_v29, %v943_v27  ;;  %v1064_v34 = vadd.f32 %v1063_v32, %v1062_v30  ;;  %v1083_v36 = vadd.f32 %v1082_v35, %v1081_v31  ;;  %v1084_v37 = vpop.f32.mrb[2].mxu1 }
  0xfa   :  { %v1085_v39 = vpop.f32.mrb[3].mxu1 }
  0xfb   :  { %v760_v38 = vadd.f32 %v1064_v34, %v943_v27  ;;  %v798_v40 = vadd.f32 %v1083_v36, %v757_v33  ;;  %v1086_v41 = vadd.f32 %v1085_v39, %v1084_v37 }
  0xfd   :  { %v801_v42 = vadd.f32 %v1086_v41, %v760_v38 }
 0x115   :  { %v1103_v43 = vpop.f32.mrb[4].mxu0 }
 0x116   :  { %v1104_v44 = vpop.f32.mrb[5].mxu0 }
 0x117   :  { %v1105_v45 = vadd.f32 %v1104_v44, %v1103_v43  ;;  %v1106_v46 = vpop.f32.mrb[6].mxu0  ;;  %v1125_v49 = vpop.f32.mrb[4].mxu1 }
 0x118   :  { %v1107_v47 = vpop.f32.mrb[7].mxu0  ;;  %v1126_v51 = vpop.f32.mrb[5].mxu1 }
 0x119   :  { %v839_v48 = vadd.f32 %v1105_v45, %v798_v40  ;;  %v1108_v50 = vadd.f32 %v1107_v47, %v1106_v46  ;;  %v1127_v53 = vadd.f32 %v1126_v51, %v1125_v49  ;;  %v1128_v54 = vpop.f32.mrb[6].mxu1 }
 0x11a   :  { %v1129_v55 = vpop.f32.mrb[7].mxu1 }
 0x11b   :  { %v842_v52 = vadd.f32 %v1108_v50, %v801_v42  ;;  %v880_v56 = vadd.f32 %v1127_v53, %v839_v48  ;;  %v1130_v57 = vadd.f32 %v1129_v55, %v1128_v54 }
 0x11d   :  { %v883_v58 = vadd.f32 %v1130_v57, %v842_v52 }
 0x135   :  { %v1147_v59 = vpop.f32.mrb[8].mxu0 }
 0x136   :  { %v1148_v60 = vpop.f32.mrb[9].mxu0 }
 0x137   :  { %v1149_v61 = vadd.f32 %v1148_v60, %v1147_v59  ;;  %v1150_v62 = vpop.f32.mrb[10].mxu0 }
 0x138   :  { %v1151_v63 = vpop.f32.mrb[11].mxu0 }
 0x139   :  { %v921_v0 = vadd.f32 %v1149_v61, %v880_v56  ;;  %v1152_v1 = vadd.f32 %v1151_v63, %v1150_v62 }
 0x13b   :  { %v924_v2 = vadd.f32 %v1152_v1, %v883_v58  ;;  %v927_v3 = vmax.f32 %v921_v0, 0.0 }
 0x13d   :  { %v928_v4 = vmax.f32 %v924_v2, 0.0 }
 0x13f   :  { %v1041_v5 = vpack.c.bf16 %v928_v4, %v927_v3 }
 0x141   :  { %1042 = vst [vmem:[%s1547_s3] sm:$0xff] %v1041_v5  }

// kernel: dqn_forward.10
= control target key start
LH: loop header
LB: loop body
LE: loop exit
PB: predicated region body
PF: predicated region fallthrough
CT: control target
= control target key end

     0   :  { %vm1651_vm0 = vmmov 0   ;;  %s2029_s1 = inlined_call_operand.vmem [shape: bf16[1664,128], index: 1, kind: input, shape index: {}]   ;;  %s2030_s0 = inlined_call_operand.vmem [shape: bf16[16,1664], index: 0, kind: input, shape index: {}]   ;;  %s2031_s2 = inlined_call_operand.vmem [shape: f32[1,128], index: 2, kind: input, shape index: {}]   ;;  %s2032_s3 = inlined_call_operand.vmem [shape: bf16[16,128], index: 3, kind: output, shape index: {}]  }
   0x1   :  { %v1527_v0 = vld [vmem:[%s2029_s1 + $0x40] sm:$0xff]   ;;  %v1531_v4 = vld [vmem:[%s2029_s1 + $0x48] sm:$0xff]   ;;  %v1535_v8 = vld [vmem:[%s2029_s1 + $0x50] sm:$0xff]  }
   0x2   :  { %v1528_v1 = vld [vmem:[%s2029_s1] sm:$0xff]   ;;  %1364 = vmatprep.subr.bf16.mxu0 %v1527_v0  ;;  %v1532_v5 = vld [vmem:[%s2029_s1 + $0x8] sm:$0xff]   ;;  %v1536_v9 = vld [vmem:[%s2029_s1 + $0x10] sm:$0xff]  }
   0x3   :  { %v1529_v2 = vld [vmem:[%s2029_s1 + $0xc0] sm:$0xff]   ;;  %1365 = vmatpush3.bf16.msra.mxu0 %v1528_v1  ;;  %v1533_v6 = vld [vmem:[%s2029_s1 + $0xc8] sm:$0xff]   ;;  %v1537_v10 = vld [vmem:[%s2029_s1 + $0xd0] sm:$0xff]  }
   0x4   :  { %v1530_v3 = vld [vmem:[%s2029_s1 + $0x80] sm:$0xff]   ;;  %1386 = vmatprep.subr.bf16.mxu1 %v1529_v2  ;;  %1366 = vmatprep.subr.bf16.mxu0 %v1531_v4  ;;  %v1534_v7 = vld [vmem:[%s2029_s1 + $0x88] sm:$0xff]   ;;  %v1538_v11 = vld [vmem:[%s2029_s1 + $0x90] sm:$0xff]  }
   0x5   :  { %1387 = vmatpush3.bf16.msra.mxu1 %v1530_v3  ;;  %v1539_v12 = vld [vmem:[%s2029_s1 + $0x58] sm:$0xff]   ;;  %v1543_v16 = vld [vmem:[%s2029_s1 + $0x60] sm:$0xff]   ;;  %v1547_v20 = vld [vmem:[%s2029_s1 + $0x68] sm:$0xff]  }
   0x6   :  { %1388 = vmatprep.subr.bf16.mxu1 %v1533_v6  ;;  %v1540_v13 = vld [vmem:[%s2029_s1 + $0x18] sm:$0xff]   ;;  %v1544_v17 = vld [vmem:[%s2029_s1 + $0x20] sm:$0xff]   ;;  %v1548_v21 = vld [vmem:[%s2029_s1 + $0x28] sm:$0xff]  }
   0x7   :  { %1367 = vmatpush3.bf16.msra.mxu0 %v1532_v5  ;;  %v1541_v14 = vld [vmem:[%s2029_s1 + $0xd8] sm:$0xff]   ;;  %v1545_v18 = vld [vmem:[%s2029_s1 + $0xe0] sm:$0xff]   ;;  %v1549_v22 = vld [vmem:[%s2029_s1 + $0xe8] sm:$0xff]  }
   0x8   :  { %1368 = vmatprep.subr.bf16.mxu0 %v1535_v8  ;;  %v1542_v15 = vld [vmem:[%s2029_s1 + $0x98] sm:$0xff]   ;;  %v1546_v19 = vld [vmem:[%s2029_s1 + $0xa0] sm:$0xff]   ;;  %v1550_v23 = vld [vmem:[%s2029_s1 + $0xa8] sm:$0xff]  }
   0x9   :  { %1389 = vmatpush3.bf16.msra.mxu1 %v1534_v7  ;;  %v1551_v24 = vld [vmem:[%s2029_s1 + $0x70] sm:$0xff]   ;;  %v1555_v28 = vld [vmem:[%s2029_s1 + $0x78] sm:$0xff]   ;;  %v1562_v34 = vld [vmem:[%s2029_s1 + $0x140] sm:$0xff]  }
   0xa   :  { %1390 = vmatprep.subr.bf16.mxu1 %v1537_v10  ;;  %v1552_v25 = vld [vmem:[%s2029_s1 + $0x30] sm:$0xff]   ;;  %v1556_v29 = vld [vmem:[%s2029_s1 + $0x38] sm:$0xff]   ;;  %v1565_v36 = vld [vmem:[%s2030_s0 + $0xc] ss:$52 sps:$4 sm:$0xff]  }
   0xb   :  { %1369 = vmatpush3.bf16.msra.mxu0 %v1536_v9  ;;  %v1553_v26 = vld [vmem:[%s2029_s1 + $0xf0] sm:$0xff]   ;;  %v1557_v30 = vld [vmem:[%s2029_s1 + $0xf8] sm:$0xff]   ;;  %v1566_v37 = vld [vmem:[%s2029_s1 + $0x100] sm:$0xff]   ;;  %1007 = vmatprep.mubr.bf16.mxu1 %v1565_v36 }
   0xc   :  { %1370 = vmatprep.subr.bf16.mxu0 %v1539_v12  ;;  %v1554_v27 = vld [vmem:[%s2029_s1 + $0xb0] sm:$0xff]   ;;  %v1560_v32 = vld [vmem:[%s2030_s0 + $0x4] ss:$52 sps:$4 sm:$0xff]   ;;  %v1563_v35 = vld [vmem:[%s2030_s0 + $0x8] ss:$52 sps:$4 sm:$0xff]  }
   0xd   :  { %1391 = vmatpush3.bf16.msra.mxu1 %v1538_v11  ;;  %v1558_v31 = vld [vmem:[%s2030_s0] ss:$52 sps:$4 sm:$0xff]   ;;  %v1561_v33 = vld [vmem:[%s2029_s1 + $0xb8] sm:$0xff]   ;;  %966 = vmatprep.mubr.bf16.mxu0 %v1560_v32  ;;  %v1569_v40 = vld [vmem:[%s2029_s1 + $0x148] sm:$0xff]  }
   0xe   :  { %1392 = vmatprep.subr.bf16.mxu1 %v1541_v14  ;;  %v1567_v38 = vld [vmem:[%s2029_s1 + $0x1c0] sm:$0xff]   ;;  %v1570_v41 = vld [vmem:[%s2029_s1 + $0x108] sm:$0xff]   ;;  %v1573_v44 = vld [vmem:[%s2029_s1 + $0x150] sm:$0xff]  }
   0xf   :  { %1371 = vmatpush3.bf16.msra.mxu0 %v1540_v13  ;;  %v1568_v39 = vld [vmem:[%s2029_s1 + $0x180] sm:$0xff]   ;;  %v1571_v42 = vld [vmem:[%s2029_s1 + $0x1c8] sm:$0xff]   ;;  %v1574_v45 = vld [vmem:[%s2029_s1 + $0x110] sm:$0xff]  }
  0x10   :  { %1372 = vmatprep.subr.bf16.mxu0 %v1543_v16  ;;  %v1572_v43 = vld [vmem:[%s2029_s1 + $0x188] sm:$0xff]   ;;  %v1575_v46 = vld [vmem:[%s2029_s1 + $0x1d0] sm:$0xff]   ;;  %v1577_v48 = vld [vmem:[%s2029_s1 + $0x158] sm:$0xff]  }
  0x11   :  { %1393 = vmatpush3.bf16.msra.mxu1 %v1542_v15  ;;  %v1576_v47 = vld [vmem:[%s2029_s1 + $0x190] sm:$0xff]   ;;  %v1578_v49 = vld [vmem:[%s2029_s1 + $0x118] sm:$0xff]   ;;  %v1581_v52 = vld [vmem:[%s2029_s1 + $0x160] sm:$0xff]  }
  0x12   :  { %1394 = vmatprep.subr.bf16.mxu1 %v1545_v18  ;;  %v1579_v50 = vld [vmem:[%s2029_s1 + $0x1d8] sm:$0xff]   ;;  %v1582_v53 = vld [vmem:[%s2029_s1 + $0x120] sm:$0xff]   ;;  %v1585_v56 = vld [vmem:[%s2029_s1 + $0x168] sm:$0xff]  }
  0x13   :  { %1373 = vmatpush3.bf16.msra.mxu0 %v1544_v17  ;;  %v1580_v51 = vld [vmem:[%s2029_s1 + $0x198] sm:$0xff]   ;;  %v1583_v54 = vld [vmem:[%s2029_s1 + $0x1e0] sm:$0xff]   ;;  %v1586_v57 = vld [vmem:[%s2029_s1 + $0x128] sm:$0xff]  }
  0x14   :  { %1374 = vmatprep.subr.bf16.mxu0 %v1547_v20  ;;  %v1584_v55 = vld [vmem:[%s2029_s1 + $0x1a0] sm:$0xff]   ;;  %v1587_v58 = vld [vmem:[%s2029_s1 + $0x1e8] sm:$0xff]   ;;  %v1589_v60 = vld [vmem:[%s2029_s1 + $0x170] sm:$0xff]  }
  0x15   :  { %1395 = vmatpush3.bf16.msra.mxu1 %v1546_v19  ;;  %v1588_v59 = vld [vmem:[%s2029_s1 + $0x1a8] sm:$0xff]   ;;  %v1590_v61 = vld [vmem:[%s2029_s1 + $0x130] sm:$0xff]   ;;  %v1593_v0 = vld [vmem:[%s2029_s1 + $0x178] sm:$0xff]  }
  0x16   :  { %1396 = vmatprep.subr.bf16.mxu1 %v1549_v22  ;;  %v1591_v62 = vld [vmem:[%s2029_s1 + $0x1f0] sm:$0xff]   ;;  %v1594_v1 = vld [vmem:[%s2029_s1 + $0x138] sm:$0xff]   ;;  %v1600_v6 = vld [vmem:[%s2029_s1 + $0x240] sm:$0xff]  }
  0x17   :  { %1375 = vmatpush3.bf16.msra.mxu0 %v1548_v21  ;;  %v1592_v63 = vld [vmem:[%s2029_s1 + $0x1b0] sm:$0xff]   ;;  %v1595_v2 = vld [vmem:[%s2029_s1 + $0x1f8] sm:$0xff]   ;;  %v1604_v9 = vld [vmem:[%s2029_s1 + $0x200] sm:$0xff]  }
  0x18   :  { %1376 = vmatprep.subr.bf16.mxu0 %v1551_v24  ;;  %v1596_v3 = vld [vmem:[%s2030_s0 + $0x10] ss:$52 sps:$4 sm:$0xff]   ;;  %v1598_v4 = vld [vmem:[%s2030_s0 + $0x14] ss:$52 sps:$4 sm:$0xff]   ;;  %v1599_v5 = vld [vmem:[%s2029_s1 + $0x1b8] sm:$0xff]  }
  0x19   :  { %1397 = vmatpush3.bf16.msra.mxu1 %v1550_v23  ;;  %v1601_v7 = vld [vmem:[%s2030_s0 + $0x18] ss:$52 sps:$4 sm:$0xff]   ;;  %v1603_v8 = vld [vmem:[%s2030_s0 + $0x1c] ss:$52 sps:$4 sm:$0xff]   ;;  %v1605_v10 = vld [vmem:[%s2029_s1 + $0x2c0] sm:$0xff]  }
  0x1a   :  { %1398 = vmatprep.subr.bf16.mxu1 %v1553_v26  ;;  %v1606_v11 = vld [vmem:[%s2029_s1 + $0x280] sm:$0xff]   ;;  %v1607_v12 = vld [vmem:[%s2029_s1 + $0x248] sm:$0xff]   ;;  %v1611_v16 = vld [vmem:[%s2029_s1 + $0x250] sm:$0xff]  }
  0x1b   :  { %1377 = vmatpush3.bf16.msra.mxu0 %v1552_v25  ;;  %v1608_v13 = vld [vmem:[%s2029_s1 + $0x208] sm:$0xff]   ;;  %v1612_v17 = vld [vmem:[%s2029_s1 + $0x210] sm:$0xff]   ;;  %v1615_v20 = vld [vmem:[%s2029_s1 + $0x258] sm:$0xff]  }
  0x1c   :  { %1378 = vmatprep.subr.bf16.mxu0 %v1555_v28  ;;  %v1609_v14 = vld [vmem:[%s2029_s1 + $0x2c8] sm:$0xff]   ;;  %v1613_v18 = vld [vmem:[%s2029_s1 + $0x2d0] sm:$0xff]   ;;  %v1616_v21 = vld [vmem:[%s2029_s1 + $0x218] sm:$0xff]  }
  0x1d   :  { %1399 = vmatpush3.bf16.msra.mxu1 %v1554_v27  ;;  %v1610_v15 = vld [vmem:[%s2029_s1 + $0x288] sm:$0xff]   ;;  %v1614_v19 = vld [vmem:[%s2029_s1 + $0x290] sm:$0xff]   ;;  %v1617_v22 = vld [vmem:[%s2029_s1 + $0x2d8] sm:$0xff]  }
  0x1e   :  { %1400 = vmatprep.subr.bf16.mxu1 %v1557_v30  ;;  %v1618_v23 = vld [vmem:[%s2029_s1 + $0x298] sm:$0xff]   ;;  %v1619_v24 = vld [vmem:[%s2029_s1 + $0x260] sm:$0xff]   ;;  %v1623_v28 = vld [vmem:[%s2029_s1 + $0x268] sm:$0xff]  }
  0x1f   :  { %1379 = vmatpush3.bf16.msra.mxu0 %v1556_v29  ;;  %v1620_v25 = vld [vmem:[%s2029_s1 + $0x220] sm:$0xff]   ;;  %v1624_v29 = vld [vmem:[%s2029_s1 + $0x228] sm:$0xff]   ;;  %v1627_v32 = vld [vmem:[%s2029_s1 + $0x270] sm:$0xff]  }
  0x20   :  { %1408 = vmatprep.subr.bf16.mxu0 %v1562_v34  ;;  %v1621_v26 = vld [vmem:[%s2029_s1 + $0x2e0] sm:$0xff]   ;;  %v1625_v30 = vld [vmem:[%s2029_s1 + $0x2e8] sm:$0xff]   ;;  %v1629_v34 = vld [vmem:[%s2029_s1 + $0x2f0] sm:$0xff]  }
  0x21   :  { %1401 = vmatpush3.bf16.msra.mxu1 %v1561_v33  ;;  %v1622_v27 = vld [vmem:[%s2029_s1 + $0x2a0] sm:$0xff]   ;;  %v1628_v33 = vld [vmem:[%s2029_s1 + $0x230] sm:$0xff]   ;;  %v1631_v36 = vld [vmem:[%s2029_s1 + $0x278] sm:$0xff]  }
  0x22   :  { %967 = vmatmul.mubr.bf16.vlgmr.msra.gmra.mrb[0].mxu0 %v1558_v31  ;;  %1430 = vmatprep.subr.bf16.mxu1 %v1567_v38  ;;  %v1626_v31 = vld [vmem:[%s2029_s1 + $0x2a8] sm:$0xff]   ;;  %v1633_v38 = vld [vmem:[%s2029_s1 + $0x2f8] sm:$0xff]  }
  0x23   :  { %1409 = vmatpush3.bf16.msra.mxu0 %v1566_v37  ;;  %1048 = vmatprep.mubr.bf16.mxu0 %v1598_v4  ;;  %v1632_v37 = vld [vmem:[%s2029_s1 + $0x238] sm:$0xff]  }
  0x24   :  { %1008 = vmatmul.mubr.bf16.vlgmr.msra.gmra.mrb[0].mxu1 %v1563_v35  ;;  %1410 = vmatprep.subr.bf16.mxu0 %v1569_v40  ;;  %v1630_v35 = vld [vmem:[%s2029_s1 + $0x2b0] sm:$0xff]   ;;  %v1636_v40 = vld [vmem:[%s2030_s0 + $0x24] ss:$52 sps:$4 sm:$0xff]  }
  0x25   :  { %1431 = vmatpush3.bf16.msra.mxu1 %v1568_v39  ;;  %1089 = vmatprep.mubr.bf16.mxu1 %v1603_v8  ;;  %v1634_v39 = vld [vmem:[%s2030_s0 + $0x20] ss:$52 sps:$4 sm:$0xff]  }
  0x26   :  { %1432 = vmatprep.subr.bf16.mxu1 %v1571_v42  ;;  %v1650_v42 = vmov 0.0  }
  0x27   :  { %1411 = vmatpush3.bf16.msra.mxu0 %v1570_v41  ;;  %v1637_v41 = vld [vmem:[%s2029_s1 + $0x2b8] sm:$0xff]  }
  0x28   :  { %1412 = vmatprep.subr.bf16.mxu0 %v1573_v44  ;;  %v1640_v44 = vld [vmem:[%s2030_s0 + $0x2c] ss:$52 sps:$4 sm:$0xff]  }
  0x29   :  { %1433 = vmatpush3.bf16.msra.mxu1 %v1572_v43  ;;  %v1638_v43 = vld [vmem:[%s2030_s0 + $0x28] ss:$52 sps:$4 sm:$0xff]  }
  0x2a   :  { %1434 = vmatprep.subr.bf16.mxu1 %v1575_v46  ;;  %v1642_v46 = vld [vmem:[%s2029_s1 + $0x308] sm:$0xff]  }
  0x2b   :  { %1413 = vmatpush3.bf16.msra.mxu0 %v1574_v45  ;;  %v1641_v45 = vld [vmem:[%s2029_s1 + $0x300] sm:$0xff]  }
  0x2c   :  { %1414 = vmatprep.subr.bf16.mxu0 %v1577_v48  ;;  %v1644_v48 = vld [vmem:[%s2029_s1 + $0x318] sm:$0xff]  }
  0x2d   :  { %1435 = vmatpush3.bf16.msra.mxu1 %v1576_v47  ;;  %v1643_v47 = vld [vmem:[%s2029_s1 + $0x310] sm:$0xff]  }
  0x2e   :  { %1436 = vmatprep.subr.bf16.mxu1 %v1579_v50  ;;  %v1646_v50 = vld [vmem:[%s2029_s1 + $0x328] sm:$0xff]  }
  0x2f   :  { %1415 = vmatpush3.bf16.msra.mxu0 %v1578_v49  ;;  %v1645_v49 = vld [vmem:[%s2029_s1 + $0x320] sm:$0xff]  }
  0x30   :  { %1416 = vmatprep.subr.bf16.mxu0 %v1581_v52  ;;  %v1648_v52 = vld [vmem:[%s2029_s1 + $0x338] sm:$0xff]  }
  0x31   :  { %1437 = vmatpush3.bf16.msra.mxu1 %v1580_v51  ;;  %v1647_v51 = vld [vmem:[%s2029_s1 + $0x330] sm:$0xff]  }
  0x32   :  { %1438 = vmatprep.subr.bf16.mxu1 %v1583_v54 }
  0x33   :  { %1417 = vmatpush3.bf16.msra.mxu0 %v1582_v53  ;;  %v1649_v53 = vld [vmem:[%s2030_s0 + $0x30] ss:$52 sps:$4 sm:$0xff]  }
  0x34   :  { %1418 = vmatprep.subr.bf16.mxu0 %v1585_v56 }
  0x35   :  { %1439 = vmatpush3.bf16.msra.mxu1 %v1584_v55  ;;  %v1237_v55 = vld [vmem:[%s2031_s2] ss:$0 sm:$0xff] }
  0x36   :  { %1440 = vmatprep.subr.bf16.mxu1 %v1587_v58 }
  0x37   :  { %1419 = vmatpush3.bf16.msra.mxu0 %v1586_v57 }
  0x38   :  { %1420 = vmatprep.subr.bf16.mxu0 %v1589_v60 }
  0x39   :  { %1441 = vmatpush3.bf16.msra.mxu1 %v1588_v59 }
  0x3a   :  { %1442 = vmatprep.subr.bf16.mxu1 %v1591_v62 }
  0x3b   :  { %1421 = vmatpush3.bf16.msra.mxu0 %v1590_v61 }
  0x3c   :  { %1422 = vmatprep.subr.bf16.mxu0 %v1593_v0 }
  0x3d   :  { %1443 = vmatpush3.bf16.msra.mxu1 %v1592_v63 }
  0x3e   :  { %1444 = vmatprep.subr.bf16.mxu1 %v1595_v2 }
  0x3f   :  { %1423 = vmatpush3.bf16.msra.mxu0 %v1594_v1 }
  0x40   :  { %1452 = vmatprep.subr.bf16.mxu0 %v1600_v6 }
  0x41   :  { %1445 = vmatpush3.bf16.msra.mxu1 %v1599_v5 }
  0x42   :  { %1049 = vmatmul.mubr.bf16.vlgmr.msra.gmra.mrb[4].mxu0 %v1596_v3  ;;  %1474 = vmatprep.subr.bf16.mxu1 %v1605_v10 }
  0x43   :  { %1453 = vmatpush3.bf16.msra.mxu0 %v1604_v9  ;;  %1130 = vmatprep.mubr.bf16.mxu0 %v1636_v40 }
  0x44   :  { %1090 = vmatmul.mubr.bf16.vlgmr.msra.gmra.mrb[4].mxu1 %v1601_v7  ;;  %1454 = vmatprep.subr.bf16.mxu0 %v1607_v12 }
  0x45   :  { %1475 = vmatpush3.bf16.msra.mxu1 %v1606_v11  ;;  %1171 = vmatprep.mubr.bf16.mxu1 %v1640_v44 }
  0x46   :  { %1476 = vmatprep.subr.bf16.mxu1 %v1609_v14 }
  0x47   :  { %1455 = vmatpush3.bf16.msra.mxu0 %v1608_v13 }
  0x48   :  { %1456 = vmatprep.subr.bf16.mxu0 %v1611_v16 }
  0x49   :  { %1477 = vmatpush3.bf16.msra.mxu1 %v1610_v15 }
  0x4a   :  { %1478 = vmatprep.subr.bf16.mxu1 %v1613_v18 }
  0x4b   :  { %1457 = vmatpush3.bf16.msra.mxu0 %v1612_v17 }
  0x4c   :  { %1458 = vmatprep.subr.bf16.mxu0 %v1615_v20 }
  0x4d   :  { %1479 = vmatpush3.bf16.msra.mxu1 %v1614_v19 }
  0x4e   :  { %1480 = vmatprep.subr.bf16.mxu1 %v1617_v22 }
  0x4f   :  { %1459 = vmatpush3.bf16.msra.mxu0 %v1616_v21 }
  0x50   :  { %1460 = vmatprep.subr.bf16.mxu0 %v1619_v24 }
  0x51   :  { %1481 = vmatpush3.bf16.msra.mxu1 %v1618_v23 }
  0x52   :  { %1482 = vmatprep.subr.bf16.mxu1 %v1621_v26 }
  0x53   :  { %1461 = vmatpush3.bf16.msra.mxu0 %v1620_v25 }
  0x54   :  { %1462 = vmatprep.subr.bf16.mxu0 %v1623_v28 }
  0x55   :  { %1483 = vmatpush3.bf16.msra.mxu1 %v1622_v27 }
  0x56   :  { %1484 = vmatprep.subr.bf16.mxu1 %v1625_v30 }
  0x57   :  { %1463 = vmatpush3.bf16.msra.mxu0 %v1624_v29 }
  0x58   :  { %1464 = vmatprep.subr.bf16.mxu0 %v1627_v32 }
  0x59   :  { %1485 = vmatpush3.bf16.msra.mxu1 %v1626_v31 }
  0x5a   :  { %1486 = vmatprep.subr.bf16.mxu1 %v1629_v34 }
  0x5b   :  { %1465 = vmatpush3.bf16.msra.mxu0 %v1628_v33 }
  0x5c   :  { %1466 = vmatprep.subr.bf16.mxu0 %v1631_v36 }
  0x5d   :  { %1487 = vmatpush3.bf16.msra.mxu1 %v1630_v35 }
  0x5e   :  { %1488 = vmatprep.subr.bf16.mxu1 %v1633_v38 }
  0x5f   :  { %1467 = vmatpush3.bf16.msra.mxu0 %v1632_v37 }
  0x60   :  { %1505 = vmatprep.subr.bf16.mxu0 %v1650_v42 }
  0x61   :  { %1489 = vmatpush3.bf16.msra.mxu1 %v1637_v41 }
  0x62   :  { %1131 = vmatmul.mubr.bf16.vlgmr.msra.gmra.mrb[8].mxu0 %v1634_v39 }
  0x63   :  { %1521 = vmatprep.mubr.msk.bf16.mxu0 %vm1651_vm0, %v1650_v42  ;;  %1506 = vmatpush3.bf16.msra.mxu0 %v1641_v45 }
  0x64   :  { %1172 = vmatmul.mubr.bf16.vlgmr.msra.gmra.mrb[8].mxu1 %v1638_v43  ;;  %1507 = vmatprep.subr.bf16.mxu0 %v1650_v42 }
  0x67   :  { %1508 = vmatpush3.bf16.msra.mxu0 %v1642_v46 }
  0x68   :  { %1509 = vmatprep.subr.bf16.mxu0 %v1650_v42 }
  0x6b   :  { %1510 = vmatpush3.bf16.msra.mxu0 %v1643_v47 }
  0x6c   :  { %1511 = vmatprep.subr.bf16.mxu0 %v1650_v42 }
  0x6f   :  { %1512 = vmatpush3.bf16.msra.mxu0 %v1644_v48 }
  0x70   :  { %1513 = vmatprep.subr.bf16.mxu0 %v1650_v42 }
  0x73   :  { %1514 = vmatpush3.bf16.msra.mxu0 %v1645_v49 }
  0x74   :  { %1515 = vmatprep.subr.bf16.mxu0 %v1650_v42 }
  0x77   :  { %1516 = vmatpush3.bf16.msra.mxu0 %v1646_v50 }
  0x78   :  { %1517 = vmatprep.subr.bf16.mxu0 %v1650_v42 }
  0x7b   :  { %1518 = vmatpush3.bf16.msra.mxu0 %v1647_v51 }
  0x7c   :  { %1519 = vmatprep.subr.bf16.mxu0 %v1650_v42 }
  0x7f   :  { %1520 = vmatpush3.bf16.msra.mxu0 %v1648_v52 }
  0x82   :  { %1522 = vmatmul.mubr.bf16.vlgmr.msra.gmra.mrb[12].mxu0 %v1649_v53 }
  0xf5   :  { %v1380_v54 = vpop.f32.mrb[0].mxu0 }
  0xf6   :  { %v1381_v56 = vpop.f32.mrb[1].mxu0 }
  0xf7   :  { %v1382_v57 = vadd.f32 %v1381_v56, %v1380_v54  ;;  %v1383_v58 = vpop.f32.mrb[2].mxu0  ;;  %v1402_v59 = vpop.f32.mrb[0].mxu1 }
  0xf8   :  { %v1384_v60 = vpop.f32.mrb[3].mxu0  ;;  %v1403_v63 = vpop.f32.mrb[1].mxu1 }
  0xf9   :  { %v969_v61 = vadd.f32 %v1382_v57, %v1237_v55  ;;  %v1385_v62 = vadd.f32 %v1384_v60, %v1383_v58  ;;  %v1404_v0 = vadd.f32 %v1403_v63, %v1402_v59  ;;  %v1405_v1 = vpop.f32.mrb[2].mxu1 }
  0xfa   :  { %v1406_v3 = vpop.f32.mrb[3].mxu1 }
  0xfb   :  { %v972_v2 = vadd.f32 %v1385_v62, %v1237_v55  ;;  %v1010_v4 = vadd.f32 %v1404_v0, %v969_v61  ;;  %v1407_v5 = vadd.f32 %v1406_v3, %v1405_v1 }
  0xfd   :  { %v1013_v6 = vadd.f32 %v1407_v5, %v972_v2 }
 0x115   :  { %v1424_v7 = vpop.f32.mrb[4].mxu0 }
 0x116   :  { %v1425_v8 = vpop.f32.mrb[5].mxu0 }
 0x117   :  { %v1426_v9 = vadd.f32 %v1425_v8, %v1424_v7  ;;  %v1427_v10 = vpop.f32.mrb[6].mxu0  ;;  %v1446_v13 = vpop.f32.mrb[4].mxu1 }
 0x118   :  { %v1428_v11 = vpop.f32.mrb[7].mxu0  ;;  %v1447_v15 = vpop.f32.mrb[5].mxu1 }
 0x119   :  { %v1051_v12 = vadd.f32 %v1426_v9, %v1010_v4  ;;  %v1429_v14 = vadd.f32 %v1428_v11, %v1427_v10  ;;  %v1448_v17 = vadd.f32 %v1447_v15, %v1446_v13  ;;  %v1449_v18 = vpop.f32.mrb[6].mxu1 }
 0x11a   :  { %v1450_v19 = vpop.f32.mrb[7].mxu1 }
 0x11b   :  { %v1054_v16 = vadd.f32 %v1429_v14, %v1013_v6  ;;  %v1092_v20 = vadd.f32 %v1448_v17, %v1051_v12  ;;  %v1451_v21 = vadd.f32 %v1450_v19, %v1449_v18 }
 0x11d   :  { %v1095_v22 = vadd.f32 %v1451_v21, %v1054_v16 }
 0x135   :  { %v1468_v23 = vpop.f32.mrb[8].mxu0 }
 0x136   :  { %v1469_v24 = vpop.f32.mrb[9].mxu0 }
 0x137   :  { %v1470_v25 = vadd.f32 %v1469_v24, %v1468_v23  ;;  %v1471_v26 = vpop.f32.mrb[10].mxu0  ;;  %v1490_v27 = vpop.f32.mrb[8].mxu1 }
 0x138   :  { %v1472_v28 = vpop.f32.mrb[11].mxu0  ;;  %v1491_v31 = vpop.f32.mrb[9].mxu1 }
 0x139   :  { %v1133_v29 = vadd.f32 %v1470_v25, %v1092_v20  ;;  %v1473_v30 = vadd.f32 %v1472_v28, %v1471_v26  ;;  %v1492_v32 = vadd.f32 %v1491_v31, %v1490_v27  ;;  %v1493_v33 = vpop.f32.mrb[10].mxu1 }
 0x13a   :  { %v1494_v35 = vpop.f32.mrb[11].mxu1 }
 0x13b   :  { %v1136_v34 = vadd.f32 %v1473_v30, %v1095_v22  ;;  %v1495_v36 = vadd.f32 %v1494_v35, %v1493_v33  ;;  %v1174_v37 = vadd.f32 %v1492_v32, %v1133_v29 }
 0x13d   :  { %v1177_v38 = vadd.f32 %v1495_v36, %v1136_v34 }
 0x155   :  { %v1214_v39 = vpop.f32.mrb[12].mxu0 }
 0x156   :  { %v1215_v40 = vadd.f32 %v1214_v39, %v1174_v37  ;;  %v1523_v41 = vpop.f32.mrb[13].mxu0 }
 0x157   :  { %v1217_v42 = vpop.f32.mrb[14].mxu0 }
 0x158   :  { %v1218_v43 = vadd.f32 %v1217_v42, %v1177_v38  ;;  %v1524_v44 = vpop.f32.mrb[15].mxu0  ;;  %v1221_v45 = vmax.f32 %v1215_v40, 0.0 }
 0x15a   :  { %v1222_v46 = vmax.f32 %v1218_v43, 0.0 }
 0x15c   :  { %v1362_v47 = vpack.c.bf16 %v1222_v46, %v1221_v45 }
 0x15e   :  { %1363 = vst [vmem:[%s2032_s3] sm:$0xff] %v1362_v47  }

// kernel: dqn_forward.11
= control target key start
LH: loop header
LB: loop body
LE: loop exit
PB: predicated region body
PF: predicated region fallthrough
CT: control target
= control target key end

     0   :  { %v886_v1 = vmov 0   ;;  %s1124_s1 = inlined_call_operand.vmem [shape: bf16[128,512], index: 1, kind: input, shape index: {}]   ;;  %s1125_s0 = inlined_call_operand.vmem [shape: bf16[16,128], index: 0, kind: input, shape index: {}]   ;;  %s1126_s3 = inlined_call_operand.vmem [shape: bf16[512,128], index: 3, kind: input, shape index: {}]   ;;  %s1127_s2 = inlined_call_operand.vmem [shape: f32[1,512], index: 2, kind: input, shape index: {}]   ;;  %s1128_s4 = inlined_call_operand.vmem [shape: f32[1,128], index: 4, kind: input, shape index: {}]   ;;  %s1129_s5 = inlined_call_operand.vmem [shape: f32[16,128], index: 5, kind: output, shape index: {}]  }
   0x1   :  { %v805_v0 = vld [vmem:[%s1124_s1 + $0x4] ss:$16 sps:$4 sm:$0xff]   ;;  %275 = vmatprep.mubr.bf16.mxu0 %v886_v1  ;;  %318 = vmatprep.mubr.bf16.mxu1 %v886_v1  ;;  %v807_v2 = vld [vmem:[%s1124_s1 + $0xc] ss:$16 sps:$4 sm:$0xff]   ;;  %v809_v3 = vld [vmem:[%s1124_s1] ss:$16 sps:$4 sm:$0xff]  }
   0x2   :  { %243 = vmatprep.subr.bf16.mxu0 %v805_v0  ;;  %v810_v4 = vld [vmem:[%s1124_s1 + $0x8] ss:$16 sps:$4 sm:$0xff]   ;;  %286 = vmatprep.subr.bf16.mxu1 %v807_v2  ;;  %v811_v5 = vld [vmem:[%s1124_s1 + $0x24] ss:$16 sps:$4 sm:$0xff]   ;;  %v813_v6 = vld [vmem:[%s1124_s1 + $0x2c] ss:$16 sps:$4 sm:$0xff]   ;;  %v57_v2 = vlaneseq }
   0x3   :  { %244 = vmatpush1.bf16.msra.mxu0 %v809_v3  ;;  %287 = vmatpush1.bf16.msra.mxu1 %v810_v4  ;;  %v815_v7 = vld [vmem:[%s1124_s1 + $0x20] ss:$16 sps:$4 sm:$0xff]   ;;  %v816_v8 = vld [vmem:[%s1124_s1 + $0x28] ss:$16 sps:$4 sm:$0xff]   ;;  %v817_v9 = vld [vmem:[%s1124_s1 + $0x44] ss:$16 sps:$4 sm:$0xff]  }
   0x4   :  { %245 = vmatprep.subr.bf16.mxu0 %v811_v5  ;;  %288 = vmatprep.subr.bf16.mxu1 %v813_v6  ;;  %v819_v10 = vld [vmem:[%s1124_s1 + $0x4c] ss:$16 sps:$4 sm:$0xff]   ;;  %v821_v11 = vld [vmem:[%s1124_s1 + $0x40] ss:$16 sps:$4 sm:$0xff]   ;;  %v822_v12 = vld [vmem:[%s1124_s1 + $0x48] ss:$16 sps:$4 sm:$0xff]  }
   0x5   :  { %v823_v13 = vld [vmem:[%s1124_s1 + $0x64] ss:$16 sps:$4 sm:$0xff]   ;;  %v825_v14 = vld [vmem:[%s1124_s1 + $0x6c] ss:$16 sps:$4 sm:$0xff]   ;;  %v827_v15 = vld [vmem:[%s1124_s1 + $0x60] ss:$16 sps:$4 sm:$0xff]  }
   0x6   :  { %v828_v16 = vld [vmem:[%s1124_s1 + $0x68] ss:$16 sps:$4 sm:$0xff]   ;;  %v829_v17 = vld [vmem:[%s1124_s1 + $0x84] ss:$16 sps:$4 sm:$0xff]   ;;  %v831_v18 = vld [vmem:[%s1124_s1 + $0x8c] ss:$16 sps:$4 sm:$0xff]  }
   0x7   :  { %246 = vmatpush1.bf16.msra.mxu0 %v815_v7  ;;  %289 = vmatpush1.bf16.msra.mxu1 %v816_v8  ;;  %v833_v19 = vld [vmem:[%s1124_s1 + $0x80] ss:$16 sps:$4 sm:$0xff]   ;;  %v834_v20 = vld [vmem:[%s1124_s1 + $0x88] ss:$16 sps:$4 sm:$0xff]   ;;  %v835_v21 = vld [vmem:[%s1124_s1 + $0xa4] ss:$16 sps:$4 sm:$0xff]  }
   0x8   :  { %247 = vmatprep.subr.bf16.mxu0 %v817_v9  ;;  %290 = vmatprep.subr.bf16.mxu1 %v819_v10  ;;  %v837_v22 = vld [vmem:[%s1124_s1 + $0xac] ss:$16 sps:$4 sm:$0xff]   ;;  %v839_v23 = vld [vmem:[%s1124_s1 + $0xa0] ss:$16 sps:$4 sm:$0xff]   ;;  %v840_v24 = vld [vmem:[%s1124_s1 + $0xa8] ss:$16 sps:$4 sm:$0xff]  }
   0x9   :  { %v841_v25 = vld [vmem:[%s1124_s1 + $0xc4] ss:$16 sps:$4 sm:$0xff]   ;;  %v843_v26 = vld [vmem:[%s1124_s1 + $0xcc] ss:$16 sps:$4 sm:$0xff]   ;;  %v845_v27 = vld [vmem:[%s1124_s1 + $0xc0] ss:$16 sps:$4 sm:$0xff]  }
   0xa   :  { %v846_v28 = vld [vmem:[%s1124_s1 + $0xc8] ss:$16 sps:$4 sm:$0xff]   ;;  %v847_v29 = vld [vmem:[%s1124_s1 + $0xe4] ss:$16 sps:$4 sm:$0xff]   ;;  %v849_v30 = vld [vmem:[%s1124_s1 + $0xec] ss:$16 sps:$4 sm:$0xff]  }
   0xb   :  { %248 = vmatpush1.bf16.msra.mxu0 %v821_v11  ;;  %291 = vmatpush1.bf16.msra.mxu1 %v822_v12  ;;  %v851_v31 = vld [vmem:[%s1124_s1 + $0xe0] ss:$16 sps:$4 sm:$0xff]   ;;  %v852_v32 = vld [vmem:[%s1124_s1 + $0xe8] ss:$16 sps:$4 sm:$0xff]   ;;  %v58_v3 = vshrl.u32 %v57_v2, 7 }
   0xc   :  { %249 = vmatprep.subr.bf16.mxu0 %v823_v13  ;;  %292 = vmatprep.subr.bf16.mxu1 %v825_v14  ;;  %v854_v33 = vld [vmem:[%s1126_s3 + $0x40] sm:$0xff]   ;;  %v858_v38 = vld [vmem:[%s1126_s3 + $0x48] sm:$0xff]   ;;  %v862_v42 = vld [vmem:[%s1126_s3 + $0x50] sm:$0xff]  }
   0xd   :  { %v853_v34 = vld [vmem:[%s1125_s0] sm:$0xff]   ;;  %v859_v39 = vld [vmem:[%s1126_s3 + $0xc8] sm:$0xff]   ;;  %v863_v43 = vld [vmem:[%s1126_s3 + $0xd0] sm:$0xff]   ;;  %v59_v4 = vsub.s32 0, %v58_v3  ;;  %v67_v5 = vsub.s32 2, %v58_v3  ;;  %v63_v7 = vsub.s32 1, %v58_v3 }
   0xe   :  { %v855_v35 = vld [vmem:[%s1126_s3 + $0xc0] sm:$0xff]   ;;  %v860_v40 = vld [vmem:[%s1126_s3 + $0x8] sm:$0xff]   ;;  %v864_v44 = vld [vmem:[%s1126_s3 + $0x10] sm:$0xff]   ;;  %v71_v8 = vsub.s32 3, %v58_v3 }
   0xf   :  { %250 = vmatpush1.bf16.msra.mxu0 %v827_v15  ;;  %293 = vmatpush1.bf16.msra.mxu1 %v828_v16  ;;  %v856_v36 = vld [vmem:[%s1126_s3] sm:$0xff]   ;;  %v861_v41 = vld [vmem:[%s1126_s3 + $0x88] sm:$0xff]   ;;  %v865_v45 = vld [vmem:[%s1126_s3 + $0x90] sm:$0xff]  }
  0x10   :  { %251 = vmatprep.subr.bf16.mxu0 %v829_v17  ;;  %294 = vmatprep.subr.bf16.mxu1 %v831_v18  ;;  %v857_v37 = vld [vmem:[%s1126_s3 + $0x80] sm:$0xff]   ;;  %v866_v46 = vld [vmem:[%s1126_s3 + $0x58] sm:$0xff]   ;;  %v874_v54 = vld [vmem:[%s1126_s3 + $0x68] sm:$0xff]  }
  0x11   :  { %v867_v47 = vld [vmem:[%s1126_s3 + $0xd8] sm:$0xff]   ;;  %v870_v50 = vld [vmem:[%s1126_s3 + $0x60] sm:$0xff]   ;;  %v875_v55 = vld [vmem:[%s1126_s3 + $0xe8] sm:$0xff]  }
  0x12   :  { %v868_v48 = vld [vmem:[%s1126_s3 + $0x18] sm:$0xff]   ;;  %v871_v51 = vld [vmem:[%s1126_s3 + $0xe0] sm:$0xff]   ;;  %v876_v56 = vld [vmem:[%s1126_s3 + $0x28] sm:$0xff]  }
  0x13   :  { %252 = vmatpush1.bf16.msra.mxu0 %v833_v19  ;;  %295 = vmatpush1.bf16.msra.mxu1 %v834_v20  ;;  %v869_v49 = vld [vmem:[%s1126_s3 + $0x98] sm:$0xff]   ;;  %v872_v52 = vld [vmem:[%s1126_s3 + $0x20] sm:$0xff]   ;;  %v877_v57 = vld [vmem:[%s1126_s3 + $0xa8] sm:$0xff]  }
  0x14   :  { %253 = vmatprep.subr.bf16.mxu0 %v835_v21  ;;  %296 = vmatprep.subr.bf16.mxu1 %v837_v22  ;;  %v873_v53 = vld [vmem:[%s1126_s3 + $0xa0] sm:$0xff]   ;;  %v878_v58 = vld [vmem:[%s1126_s3 + $0x70] sm:$0xff]   ;;  %v882_v62 = vld [vmem:[%s1126_s3 + $0x78] sm:$0xff]  }
  0x15   :  { %v879_v59 = vld [vmem:[%s1126_s3 + $0xf0] sm:$0xff]   ;;  %v883_v63 = vld [vmem:[%s1126_s3 + $0xf8] sm:$0xff]   ;;  %v55_v6 = vld [vmem:[%s1127_s2] sm:$0xf] }
  0x16   :  { %v880_v60 = vld [vmem:[%s1126_s3 + $0x30] sm:$0xff]   ;;  %v884_v0 = vld [vmem:[%s1126_s3 + $0x38] sm:$0xff]   ;;  %v60_v9 = vrot.slane %v55_v6, %v59_v4  ;;  %v68_v10 = vrot.slane %v55_v6, %v67_v5  ;;  %v64_v11 = vrot.slane %v55_v6, %v63_v7  ;;  %v72_v12 = vrot.slane %v55_v6, %v71_v8 }
  0x17   :  { %254 = vmatpush1.bf16.msra.mxu0 %v839_v23  ;;  %297 = vmatpush1.bf16.msra.mxu1 %v840_v24  ;;  %v881_v61 = vld [vmem:[%s1126_s3 + $0xb0] sm:$0xff]   ;;  %v885_v1 = vld [vmem:[%s1126_s3 + $0xb8] sm:$0xff]  }
  0x18   :  { %255 = vmatprep.subr.bf16.mxu0 %v841_v25  ;;  %298 = vmatprep.subr.bf16.mxu1 %v843_v26 }
  0x1b   :  { %256 = vmatpush1.bf16.msra.mxu0 %v845_v27  ;;  %299 = vmatpush1.bf16.msra.mxu1 %v846_v28 }
  0x1c   :  { %257 = vmatprep.subr.bf16.mxu0 %v847_v29  ;;  %300 = vmatprep.subr.bf16.mxu1 %v849_v30 }
  0x1f   :  { %258 = vmatpush1.bf16.msra.mxu0 %v851_v31  ;;  %301 = vmatpush1.bf16.msra.mxu1 %v852_v32 }
  0x20   :  { %760 = vmatprep.subr.bf16.mxu0 %v854_v33  ;;  %782 = vmatprep.subr.bf16.mxu1 %v855_v35 }
  0x22   :  { %276 = vmatmul.mubr.bf16.vlgmr.msra.gmra.mrb[0].mxu0 %v853_v34  ;;  %319 = vmatmul.mubr.bf16.vlgmr.msra.gmra.mrb[0].mxu1 %v853_v34 }
  0x23   :  { %761 = vmatpush3.bf16.msra.mxu0 %v856_v36  ;;  %783 = vmatpush3.bf16.msra.mxu1 %v857_v37 }
  0x24   :  { %762 = vmatprep.subr.bf16.mxu0 %v858_v38  ;;  %784 = vmatprep.subr.bf16.mxu1 %v859_v39 }
  0x27   :  { %763 = vmatpush3.bf16.msra.mxu0 %v860_v40  ;;  %785 = vmatpush3.bf16.msra.mxu1 %v861_v41 }
  0x28   :  { %764 = vmatprep.subr.bf16.mxu0 %v862_v42  ;;  %786 = vmatprep.subr.bf16.mxu1 %v863_v43  ;;  %v727_v43 = vld [vmem:[%s1128_s4] ss:$0 sm:$0xff] }
  0x2b   :  { %765 = vmatpush3.bf16.msra.mxu0 %v864_v44  ;;  %787 = vmatpush3.bf16.msra.mxu1 %v865_v45 }
  0x2c   :  { %766 = vmatprep.subr.bf16.mxu0 %v866_v46  ;;  %788 = vmatprep.subr.bf16.mxu1 %v867_v47 }
  0x2f   :  { %767 = vmatpush3.bf16.msra.mxu0 %v868_v48  ;;  %789 = vmatpush3.bf16.msra.mxu1 %v869_v49 }
  0x30   :  { %768 = vmatprep.subr.bf16.mxu0 %v870_v50  ;;  %790 = vmatprep.subr.bf16.mxu1 %v871_v51 }
  0x33   :  { %769 = vmatpush3.bf16.msra.mxu0 %v872_v52  ;;  %791 = vmatpush3.bf16.msra.mxu1 %v873_v53 }
  0x34   :  { %770 = vmatprep.subr.bf16.mxu0 %v874_v54  ;;  %792 = vmatprep.subr.bf16.mxu1 %v875_v55 }
  0x37   :  { %771 = vmatpush3.bf16.msra.mxu0 %v876_v56  ;;  %793 = vmatpush3.bf16.msra.mxu1 %v877_v57 }
  0x38   :  { %772 = vmatprep.subr.bf16.mxu0 %v878_v58  ;;  %794 = vmatprep.subr.bf16.mxu1 %v879_v59 }
  0x3b   :  { %773 = vmatpush3.bf16.msra.mxu0 %v880_v60  ;;  %795 = vmatpush3.bf16.msra.mxu1 %v881_v61 }
  0x3c   :  { %774 = vmatprep.subr.bf16.mxu0 %v882_v62  ;;  %796 = vmatprep.subr.bf16.mxu1 %v883_v63 }
  0x3f   :  { %775 = vmatpush3.bf16.msra.mxu0 %v884_v0  ;;  %797 = vmatpush3.bf16.msra.mxu1 %v885_v1 }
  0xf5   :  { %v277_v13 = vpop.f32.mrb[0].mxu0  ;;  %v320_v14 = vpop.f32.mrb[0].mxu1 }
  0xf6   :  { %v278_v15 = vadd.f32 %v277_v13, %v60_v9  ;;  %v321_v16 = vadd.f32 %v320_v14, %v68_v10  ;;  %v279_v17 = vpop.f32.mrb[1].mxu0  ;;  %v322_v18 = vpop.f32.mrb[1].mxu1 }
  0xf7   :  { %v280_v19 = vadd.f32 %v279_v17, %v64_v11  ;;  %v323_v20 = vadd.f32 %v322_v18, %v72_v12  ;;  %v281_v21 = vpop.f32.mrb[2].mxu0  ;;  %v324_v22 = vpop.f32.mrb[2].mxu1 }
  0xf8   :  { %v331_v23 = vmax.f32 %v321_v16, 0.0  ;;  %v282_v24 = vadd.f32 %v281_v21, %v60_v9  ;;  %v325_v25 = vadd.f32 %v324_v22, %v68_v10  ;;  %v283_v26 = vpop.f32.mrb[3].mxu0  ;;  %v326_v27 = vpop.f32.mrb[3].mxu1  ;;  %v329_v31 = vmax.f32 %v278_v15, 0.0 }
  0xf9   :  { %v332_v28 = vmax.f32 %v323_v20, 0.0  ;;  %v284_v29 = vadd.f32 %v283_v26, %v64_v11  ;;  %v327_v30 = vadd.f32 %v326_v27, %v72_v12  ;;  %v330_v34 = vmax.f32 %v280_v19, 0.0 }
  0xfa   :  { %v333_v32 = vmax.f32 %v282_v24, 0.0  ;;  %v335_v33 = vmax.f32 %v325_v25, 0.0 }
  0xfb   :  { %v334_v35 = vmax.f32 %v284_v29, 0.0  ;;  %v336_v36 = vmax.f32 %v327_v30, 0.0 }
  0xfc   :  { %v337_v37 = vpack.c.bf16 %v333_v32, %v329_v31  ;;  %v339_v38 = vpack.c.bf16 %v335_v33, %v331_v23 }
  0xfd   :  { %v338_v39 = vpack.c.bf16 %v334_v35, %v330_v34  ;;  %v340_v40 = vpack.c.bf16 %v336_v36, %v332_v28 }
  0xff   :  { %636 = vmatprep.mubr.bf16.mxu0 %v338_v39  ;;  %677 = vmatprep.mubr.bf16.mxu1 %v340_v40 }
 0x100   :  { %637 = vmatmul.mubr.bf16.vlgmr.msra.gmra.mrb[4].mxu0 %v337_v37  ;;  %678 = vmatmul.mubr.bf16.vlgmr.msra.gmra.mrb[4].mxu1 %v339_v38 }
 0x1d3   :  { %v776_v41 = vpop.f32.mrb[4].mxu0  ;;  %v798_v42 = vpop.f32.mrb[4].mxu1 }
 0x1d4   :  { %v777_v44 = vpop.f32.mrb[5].mxu0  ;;  %v799_v45 = vpop.f32.mrb[5].mxu1 }
 0x1d5   :  { %v778_v46 = vadd.f32 %v777_v44, %v776_v41  ;;  %v800_v47 = vadd.f32 %v799_v45, %v798_v42  ;;  %v779_v48 = vpop.f32.mrb[6].mxu0  ;;  %v801_v49 = vpop.f32.mrb[6].mxu1 }
 0x1d6   :  { %v780_v50 = vpop.f32.mrb[7].mxu0  ;;  %v802_v51 = vpop.f32.mrb[7].mxu1 }
 0x1d7   :  { %v639_v52 = vadd.f32 %v778_v46, %v727_v43  ;;  %v781_v53 = vadd.f32 %v780_v50, %v779_v48  ;;  %v803_v54 = vadd.f32 %v802_v51, %v801_v49 }
 0x1d9   :  { %v680_v55 = vadd.f32 %v800_v47, %v639_v52  ;;  %v642_v56 = vadd.f32 %v781_v53, %v727_v43 }
 0x1db   :  { %v686_v57 = vmax.f32 %v680_v55, 0.0  ;;  %v683_v58 = vadd.f32 %v803_v54, %v642_v56 }
 0x1dd   :  { %688 = vst [vmem:[%s1129_s5] sm:$0xff] %v686_v57  ;;  %v687_v59 = vmax.f32 %v683_v58, 0.0 }
 0x1df   :  { %689 = vst [vmem:[%s1129_s5 + $0x8] sm:$0xff] %v687_v59 }

</bundles_post_ra>
